<compile_context>
chip_gen: v6e
topology: v6e:2x2x1
jax: 0.10.0
libtpu: 0.0.40
codegen_flags: <defaults>
</compile_context>

<pallas_src>
import jax
import jax.numpy as jnp
from jax import lax
from jax.experimental import pallas as pl
from jax.experimental.pallas import tpu as pltpu

CLASS_NUM = 12
SMOOTHING = 0.1

_G = 384 // CLASS_NUM        # samples packed per row (32)
_LANES = _G * CLASS_NUM      # 384 lanes per packed row


def _make_kernel(n_valid: int, block_r: int):
    low = SMOOTHING / (CLASS_NUM - 1)
    high = 1.0 - SMOOTHING
    inv_c = 1.0 / CLASS_NUM

    def seg_sum(v, a_sum):
        # Per-sample sum over each group of 12 lanes, done on the (idle) MXU.
        # bf16 hi/lo split keeps the result f32-accurate regardless of the MXU
        # precision mode (the 0/1 matrix entries are exact in bf16).
        hi = v.astype(jnp.bfloat16).astype(jnp.float32)
        lo = v - hi
        return (jnp.dot(hi, a_sum, preferred_element_type=jnp.float32)
                + jnp.dot(lo, a_sum, preferred_element_type=jnp.float32))

    def kernel(x_ref, t_ref, out_ref, acc_ref):
        pid = pl.program_id(0)

        @pl.when(pid == 0)
        def _init():
            acc_ref[...] = jnp.zeros_like(acc_ref)

        x = x_ref[...].astype(jnp.float32)               # (block_r, 384)
        t = t_ref[...].astype(jnp.float32)               # (block_r, 32) class ids

        # Static lane patterns, built once per step at (1, 384) and broadcast
        # over sublanes (cheap): sample slot and class id of each lane.
        lane = lax.broadcasted_iota(jnp.int32, (1, _LANES), 1).astype(jnp.float32)
        grp = jnp.floor(lane * inv_c)                    # 0..31
        cls = lane - CLASS_NUM * grp                     # 0..11

        # Tiny 0/1 helper matrices for the MXU segmented ops.
        li = lax.broadcasted_iota(jnp.int32, (_LANES, _G), 0).astype(jnp.float32)
        si = lax.broadcasted_iota(jnp.int32, (_LANES, _G), 1).astype(jnp.float32)
        a_sum = (jnp.floor(li * inv_c) == si).astype(jnp.float32)     # (384, 32)
        lj = lax.broadcasted_iota(jnp.int32, (_G, _LANES), 1).astype(jnp.float32)
        sj = lax.broadcasted_iota(jnp.int32, (_G, _LANES), 0).astype(jnp.float32)
        b_bcast = (jnp.floor(lj * inv_c) == sj).astype(jnp.float32)   # (32, 384)

        # Broadcast each sample's target id to its 12 lanes (exact small ints).
        t384 = jnp.dot(t, b_bcast, preferred_element_type=jnp.float32)  # (block_r,384)

        # Label-smoothed weights folded straight into the logits:
        #   loss_i = lse_i - sum_c w_ic * x_ic       (since sum_c w_ic == 1)
        w = jnp.where(cls == t384, high, low)            # (block_r, 384)
        wsum = seg_sum(w * x, a_sum)                     # (block_r, 32)

        # Per-sample log-sum-exp; row max (32 samples) as the stabilizer.
        m = jnp.max(x, axis=1, keepdims=True)            # (block_r, 1)
        e = jnp.exp(x - m)
        lse = m + jnp.log(seg_sum(e, a_sum))             # (block_r, 32)

        loss = lse - wsum                                # per-sample loss

        # Mask batch padding (ragged N) and the garbage rows of a partial last
        # block BEFORE accumulating, so NaN/Inf in padded lanes cannot leak in.
        ri = lax.broadcasted_iota(jnp.int32, (block_r, _G), 0)
        ci = lax.broadcasted_iota(jnp.int32, (block_r, _G), 1)
        sample = (pid * block_r + ri) * _G + ci
        loss = jnp.where(sample < n_valid, loss, jnp.float32(0.0))

        # Per-lane partial sums in a VMEM vector accumulator (no per-step SMEM
        # RMW, no per-step cross-lane reduce).
        acc_ref[...] += jnp.sum(loss, axis=0, keepdims=True)   # (1, 32)

        @pl.when(pid == pl.num_programs(0) - 1)
        def _finalize():
            out_ref[0, 0] = jnp.sum(acc_ref[...]) / jnp.float32(n_valid)

    return kernel


def label_smooth_loss(logits, target, *, block_rows=2048):
    """Label-smoothed cross entropy (mean over the batch).

    logits: (N, CLASS_NUM) float array (f32 or bf16), natural (N, C) layout.
    target: (N,) integer class ids in [0, CLASS_NUM).
    """
    n, c = logits.shape
    assert c == CLASS_NUM
    assert target.shape == (n,)
    assert n > 0

    # Pad only up to the next multiple of 32 samples (no-op when N % 32 == 0);
    # the packed reshape below is a row-major bitcast -> no transpose pass.
    n_pad = ((n + _G - 1) // _G) * _G
    if n_pad != n:
        logits = jnp.pad(logits, ((0, n_pad - n), (0, 0)))
        target = jnp.pad(target, (0, n_pad - n))
    rows = n_pad // _G
    x2d = logits.reshape(rows, _LANES)                   # (rows, 384), free reshape
    t2d = target.reshape(rows, _G).astype(jnp.int32)     # (rows, 32)

    # Block size: as many rows as allowed (sublane-aligned), full array if small.
    if rows <= block_rows:
        block_r = rows
    else:
        mult = 16 if x2d.dtype.itemsize < 4 else 8
        block_r = min(max(mult, (block_rows // mult) * mult), rows)
    num_blocks = pl.cdiv(rows, block_r)

    kernel = _make_kernel(n, block_r)
    itemsize = x2d.dtype.itemsize

    out = pl.pallas_call(
        kernel,
        out_shape=jax.ShapeDtypeStruct((1, 1), jnp.float32),
        grid_spec=pltpu.PrefetchScalarGridSpec(
            num_scalar_prefetch=0,
            grid=(num_blocks,),
            in_specs=[
                pl.BlockSpec((block_r, _LANES), lambda i: (i, 0)),
                pl.BlockSpec((block_r, _G), lambda i: (i, 0)),
            ],
            out_specs=pl.BlockSpec(memory_space=pltpu.MemorySpace.SMEM),
            scratch_shapes=[pltpu.VMEM((1, _G), jnp.float32)],
        ),
        compiler_params=pltpu.CompilerParams(
            dimension_semantics=("arbitrary",),
            vmem_limit_bytes=40 * 1024 * 1024,
        ),
        cost_estimate=pl.CostEstimate(
            flops=rows * (10 * _LANES * _G + 8 * _LANES),
            transcendentals=rows * (_LANES + _G),
            bytes_accessed=rows * (_LANES * itemsize + _G * 4) + 4,
        ),
    )(x2d, t2d)
    return out[0, 0]


def _reference(logits, target):
    log_prob = jax.nn.log_softmax(logits.astype(jnp.float32), axis=-1)
    onehot = jax.nn.one_hot(target, CLASS_NUM, dtype=jnp.float32)
    weight = jnp.clip(onehot, SMOOTHING / (CLASS_NUM - 1), 1.0 - SMOOTHING)
    return jnp.mean(jnp.sum(-weight * log_prob, axis=-1))


if __name__ == "__main__":
    key = jax.random.PRNGKey(0)
    k1, k2, k3, k4, k5, k6 = jax.random.split(key, 6)

    # Test 1: tiny batch (N < 32): single block, exercises the ragged-batch mask.
    n1 = 8
    logits1 = jax.random.normal(k1, (n1, CLASS_NUM), dtype=jnp.float32)
    target1 = jax.random.randint(k2, (n1,), 0, CLASS_NUM, dtype=jnp.int32)
    got1 = jax.block_until_ready(label_smooth_loss(logits1, target1))
    ref1 = jax.block_until_ready(_reference(logits1, target1))
    assert jnp.allclose(got1, ref1, atol=2e-5, rtol=2e-5), (got1, ref1)

    # Test 2: N=300, block_rows=8 -> 2 grid steps, partial last block + ragged tail,
    # exercising the grid accumulator and both masking paths.
    n2 = 300
    logits2 = jax.random.normal(k3, (n2, CLASS_NUM), dtype=jnp.float32) * 3.0
    target2 = jax.random.randint(k4, (n2,), 0, CLASS_NUM, dtype=jnp.int32)
    got2 = jax.block_until_ready(label_smooth_loss(logits2, target2, block_rows=8))
    ref2 = jax.block_until_ready(_reference(logits2, target2))
    assert jnp.allclose(got2, ref2, atol=2e-5, rtol=2e-5), (got2, ref2)

    # Test 3: bf16 logits, batch a multiple of 32 (no wrapper pad), several blocks.
    n3 = 1024
    logits3 = jax.random.normal(k5, (n3, CLASS_NUM), dtype=jnp.float32).astype(jnp.bfloat16)
    target3 = jax.random.randint(k6, (n3,), 0, CLASS_NUM, dtype=jnp.int32)
    got3 = jax.block_until_ready(label_smooth_loss(logits3, target3, block_rows=16))
    ref3 = jax.block_until_ready(_reference(logits3, target3))
    assert jnp.allclose(got3, ref3, atol=2e-5, rtol=2e-5), (got3, ref3)

    print("KERNEL_OK")
</pallas_src>

<mosaic_0001>
module attributes {stable_mosaic.version = 11 : i64} {
  func.func @kernel(%arg0: i32, %arg1: memref<1x384xf32, #tpu.memory_space<vmem>>, %arg2: memref<1x32xi32, #tpu.memory_space<vmem>>, %arg3: memref<1x1xf32, #tpu.memory_space<smem>>, %arg4: memref<1x32xf32, #tpu.memory_space<vmem>>) attributes {dimension_semantics = [#tpu.dimension_semantics<arbitrary>], iteration_bounds = array<i64: 1>, scalar_prefetch = 0 : i64, scratch_operands = 1 : i64, tpu.core_type = #tpu.core_type<tc>, window_params = [{transform_indices = @transform_0, window_bounds = array<i64: 1, 384>}, {transform_indices = @transform_1, window_bounds = array<i64: 1, 32>}, {transform_indices = @transform_2, window_bounds = array<i64: 1, 1>}]} {
    %c0_i32 = arith.constant 0 : i32
    %0 = arith.cmpi eq, %arg0, %c0_i32 : i32
    %1 = arith.extui %0 : i1 to i32
    %c0_i32_0 = arith.constant 0 : i32
    %2 = arith.cmpi ne, %1, %c0_i32_0 : i32
    scf.if %2 {
      %cst_23 = arith.constant 0.000000e+00 : f32
      %81 = vector.broadcast %cst_23 : f32 to vector<1x32xf32>
      %c0_24 = arith.constant 0 : index
      %c0_25 = arith.constant 0 : index
      %82 = vector.load %arg4[%c0_24, %c0_25] : memref<1x32xf32, #tpu.memory_space<vmem>>, vector<1x32xf32>
      tpu.vector_store %arg4[%c0_24, %c0_25], %81 {strides = array<i32>} : memref<1x32xf32, #tpu.memory_space<vmem>>, vector<1x32xf32>,
    } else {
    }
    %c0 = arith.constant 0 : index
    %c0_1 = arith.constant 0 : index
    %3 = vector.load %arg1[%c0, %c0_1] : memref<1x384xf32, #tpu.memory_space<vmem>>, vector<1x384xf32>
    %c0_2 = arith.constant 0 : index
    %c0_3 = arith.constant 0 : index
    %4 = vector.load %arg2[%c0_2, %c0_3] : memref<1x32xi32, #tpu.memory_space<vmem>>, vector<1x32xi32>
    %5 = arith.sitofp %4 : vector<1x32xi32> to vector<1x32xf32>
    %6 = tpu.iota {dimensions = array<i32: 1>} : vector<1x384xi32>
    %7 = arith.sitofp %6 : vector<1x384xi32> to vector<1x384xf32>
    %cst = arith.constant 0.0833333358 : f32
    %8 = vector.broadcast %cst : f32 to vector<1x384xf32>
    %9 = arith.mulf %7, %8 : vector<1x384xf32>
    %10 = math.floor %9 : vector<1x384xf32>
    %cst_4 = arith.constant 1.200000e+01 : f32
    %11 = vector.broadcast %cst_4 : f32 to vector<1x384xf32>
    %12 = arith.mulf %11, %10 : vector<1x384xf32>
    %13 = arith.subf %7, %12 : vector<1x384xf32>
    %14 = tpu.iota {dimensions = array<i32: 0>} : vector<384x32xi32>
    %15 = arith.sitofp %14 : vector<384x32xi32> to vector<384x32xf32>
    %16 = tpu.iota {dimensions = array<i32: 1>} : vector<384x32xi32>
    %17 = arith.sitofp %16 : vector<384x32xi32> to vector<384x32xf32>
    %cst_5 = arith.constant 0.0833333358 : f32
    %18 = vector.broadcast %cst_5 : f32 to vector<384x32xf32>
    %19 = arith.mulf %15, %18 : vector<384x32xf32>
    %20 = math.floor %19 : vector<384x32xf32>
    %21 = arith.cmpf oeq, %20, %17 : vector<384x32xf32>
    %22 = arith.extui %21 : vector<384x32xi1> to vector<384x32xi32>
    %23 = arith.sitofp %22 : vector<384x32xi32> to vector<384x32xf32>
    %24 = tpu.iota {dimensions = array<i32: 1>} : vector<32x384xi32>
    %25 = arith.sitofp %24 : vector<32x384xi32> to vector<32x384xf32>
    %26 = tpu.iota {dimensions = array<i32: 0>} : vector<32x384xi32>
    %27 = arith.sitofp %26 : vector<32x384xi32> to vector<32x384xf32>
    %cst_6 = arith.constant 0.0833333358 : f32
    %28 = vector.broadcast %cst_6 : f32 to vector<32x384xf32>
    %29 = arith.mulf %25, %28 : vector<32x384xf32>
    %30 = math.floor %29 : vector<32x384xf32>
    %31 = arith.cmpf oeq, %30, %27 : vector<32x384xf32>
    %32 = arith.extui %31 : vector<32x384xi1> to vector<32x384xi32>
    %33 = arith.sitofp %32 : vector<32x384xi32> to vector<32x384xf32>
    %cst_7 = arith.constant dense<0.000000e+00> : vector<1x384xf32>
    %34 = tpu.matmul %5, %33, %cst_7 {dimension_numbers = #tpu.dot_dimension_numbers<[1], [0], [0], [1], [0, 0, 1, 1], [], []>} : vector<1x32xf32>, vector<32x384xf32>, vector<1x384xf32> -> vector<1x384xf32>
    %35 = arith.cmpf oeq, %13, %34 : vector<1x384xf32>
    %cst_8 = arith.constant 0.899999976 : f32
    %cst_9 = arith.constant 0.0090909088 : f32
    %36 = vector.broadcast %cst_8 : f32 to vector<1x384xf32>
    %37 = vector.broadcast %cst_9 : f32 to vector<1x384xf32>
    %38 = arith.select %35, %36, %37 : vector<1x384xi1>, vector<1x384xf32>
    %39 = arith.mulf %38, %3 : vector<1x384xf32>
    %40 = arith.truncf %39 : vector<1x384xf32> to vector<1x384xbf16>
    %41 = arith.extf %40 : vector<1x384xbf16> to vector<1x384xf32>
    %42 = arith.subf %39, %41 : vector<1x384xf32>
    %cst_10 = arith.constant dense<0.000000e+00> : vector<1x32xf32>
    %43 = tpu.matmul %41, %23, %cst_10 {dimension_numbers = #tpu.dot_dimension_numbers<[1], [0], [0], [1], [0, 0, 1, 1], [], []>} : vector<1x384xf32>, vector<384x32xf32>, vector<1x32xf32> -> vector<1x32xf32>
    %cst_11 = arith.constant dense<0.000000e+00> : vector<1x32xf32>
    %44 = tpu.matmul %42, %23, %cst_11 {dimension_numbers = #tpu.dot_dimension_numbers<[1], [0], [0], [1], [0, 0, 1, 1], [], []>} : vector<1x384xf32>, vector<384x32xf32>, vector<1x32xf32> -> vector<1x32xf32>
    %45 = arith.addf %43, %44 : vector<1x32xf32>
    %cst_12 = arith.constant dense<0xFF800000> : vector<1xf32>
    %46 = vector.multi_reduction <maximumf>, %3, %cst_12 [1] : vector<1x384xf32> to vector<1xf32>
    %47 = vector.shape_cast %46 : vector<1xf32> to vector<1x1xf32>
    %48 = vector.broadcast %47 : vector<1x1xf32> to vector<1x384xf32>
    %49 = arith.subf %3, %48 : vector<1x384xf32>
    %50 = math.exp %49 : vector<1x384xf32>
    %51 = arith.truncf %50 : vector<1x384xf32> to vector<1x384xbf16>
    %52 = arith.extf %51 : vector<1x384xbf16> to vector<1x384xf32>
    %53 = arith.subf %50, %52 : vector<1x384xf32>
    %cst_13 = arith.constant dense<0.000000e+00> : vector<1x32xf32>
    %54 = tpu.matmul %52, %23, %cst_13 {dimension_numbers = #tpu.dot_dimension_numbers<[1], [0], [0], [1], [0, 0, 1, 1], [], []>} : vector<1x384xf32>, vector<384x32xf32>, vector<1x32xf32> -> vector<1x32xf32>
    %cst_14 = arith.constant dense<0.000000e+00> : vector<1x32xf32>
    %55 = tpu.matmul %53, %23, %cst_14 {dimension_numbers = #tpu.dot_dimension_numbers<[1], [0], [0], [1], [0, 0, 1, 1], [], []>} : vector<1x384xf32>, vector<384x32xf32>, vector<1x32xf32> -> vector<1x32xf32>
    %56 = arith.addf %54, %55 : vector<1x32xf32>
    %57 = math.log %56 : vector<1x32xf32>
    %58 = vector.broadcast %47 : vector<1x1xf32> to vector<1x32xf32>
    %59 = arith.addf %58, %57 : vector<1x32xf32>
    %60 = arith.subf %59, %45 : vector<1x32xf32>
    %61 = tpu.iota {dimensions = array<i32: 0>} : vector<1x32xi32>
    %62 = tpu.iota {dimensions = array<i32: 1>} : vector<1x32xi32>
    %c1_i32 = arith.constant 1 : i32
    %63 = arith.muli %arg0, %c1_i32 : i32
    %64 = vector.broadcast %63 : i32 to vector<1x32xi32>
    %65 = arith.addi %64, %61 : vector<1x32xi32>
    %c32_i32 = arith.constant 32 : i32
    %66 = vector.broadcast %c32_i32 : i32 to vector<1x32xi32>
    %67 = arith.muli %65, %66 : vector<1x32xi32>
    %68 = arith.addi %67, %62 : vector<1x32xi32>
    %c8_i32 = arith.constant 8 : i32
    %69 = vector.broadcast %c8_i32 : i32 to vector<1x32xi32>
    %70 = arith.cmpi slt, %68, %69 : vector<1x32xi32>
    %cst_15 = arith.constant 0.000000e+00 : f32
    %71 = vector.broadcast %cst_15 : f32 to vector<1x32xf32>
    %72 = arith.select %70, %60, %71 : vector<1x32xi1>, vector<1x32xf32>
    %c0_16 = arith.constant 0 : index
    %c0_17 = arith.constant 0 : index
    %73 = vector.load %arg4[%c0_16, %c0_17] : memref<1x32xf32, #tpu.memory_space<vmem>>, vector<1x32xf32>
    %cst_18 = arith.constant dense<0.000000e+00> : vector<32xf32>
    %74 = vector.multi_reduction <add>, %72, %cst_18 [0] : vector<1x32xf32> to vector<32xf32>
    %75 = vector.shape_cast %74 : vector<32xf32> to vector<1x32xf32>
    %76 = arith.addf %73, %75 : vector<1x32xf32>
    %c0_19 = arith.constant 0 : index
    %c0_20 = arith.constant 0 : index
    %77 = vector.load %arg4[%c0_19, %c0_20] : memref<1x32xf32, #tpu.memory_space<vmem>>, vector<1x32xf32>
    tpu.vector_store %arg4[%c0_19, %c0_20], %76 {strides = array<i32>} : memref<1x32xf32, #tpu.memory_space<vmem>>, vector<1x32xf32>,
    %c0_i32_21 = arith.constant 0 : i32
    %78 = arith.cmpi eq, %arg0, %c0_i32_21 : i32
    %79 = arith.extui %78 : i1 to i32
    %c0_i32_22 = arith.constant 0 : i32
    %80 = arith.cmpi ne, %79, %c0_i32_22 : i32
    scf.if %80 {
      %c0_23 = arith.constant 0 : index
      %c0_24 = arith.constant 0 : index
      %81 = vector.load %arg4[%c0_23, %c0_24] : memref<1x32xf32, #tpu.memory_space<vmem>>, vector<1x32xf32>
      %82 = vector.shape_cast %81 : vector<1x32xf32> to vector<1x1x32xf32>
      %cst_25 = arith.constant dense<0.000000e+00> : vector<1xf32>
      %83 = vector.multi_reduction <add>, %82, %cst_25 [1, 2] : vector<1x1x32xf32> to vector<1xf32>
      %84 = vector.shape_cast %83 : vector<1xf32> to vector<1x1x1xf32>
      %85 = vector.extract %84[0, 0, 0] : f32 from vector<1x1x1xf32>
      %cst_26 = arith.constant 8.000000e+00 : f32
      %86 = arith.divf %85, %cst_26 : f32
      %c0_27 = arith.constant 0 : index
      %c0_28 = arith.constant 0 : index
      %87 = memref.load %arg3[%c0_27, %c0_28] : memref<1x1xf32, #tpu.memory_space<smem>>
      memref.store %86, %arg3[%c0_27, %c0_28] : memref<1x1xf32, #tpu.memory_space<smem>>
    } else {
    }
    return
  }
  func.func @transform_0(%arg0: i32) -> (i32, i32) {
    %c0_i32 = arith.constant 0 : i32
    %c0_i32_0 = arith.constant 0 : i32
    return %arg0, %c0_i32 : i32, i32
  }
  func.func @transform_1(%arg0: i32) -> (i32, i32) {
    %c0_i32 = arith.constant 0 : i32
    %c0_i32_0 = arith.constant 0 : i32
    return %arg0, %c0_i32 : i32, i32
  }
  func.func @transform_2(%arg0: i32) -> (i32, i32) {
    %c0_i32 = arith.constant 0 : i32
    %c0_i32_0 = arith.constant 0 : i32
    %c0_i32_1 = arith.constant 0 : i32
    return %c0_i32, %c0_i32_0 : i32, i32
  }
}

</mosaic_0001>

<bundles_post_ra>
// kernel: tpu_custom_call.1
= control target key start
LH: loop header
LB: loop body
LE: loop exit
PB: predicated region body
PF: predicated region fallthrough
CT: control target
= control target key end

     0   :  { %7 = vsyncpa [#allocation4], 0  ;;  %s3139_s0 = inlined_call_operand.hbm [shape: f32[1,384], index: 0, kind: input, shape index: {}]   ;;  %s3140_s1 = inlined_call_operand.vmem [shape: s32[1,32], index: 1, kind: input, shape index: {}]   ;;  %s3141_s2 = inlined_call_operand.hbm [shape: f32[1,1], index: 2, kind: output, shape index: {}]  }
   0x1   :  { %8 = vsyncpa [#allocation5], 0  ;;  %s1970_s9 = smov [#allocation3]  }
   0x2   :  { %s15_s10 = sshll.u32 %s1970_s9, 4  ;;  %s16_s10 = int_to_ptr.vmem [resolvable:$true] %s15_s10 }
   0x3   :  { %s1946_s11 = scalar_lea.vmem %s16_s10, 48  ;;  %s1950_s12 = scalar_lea.vmem %s16_s10, 64 }
   0x4   :  { %p1947_p0 = scmp.ne.s32.totalorder %s16_s10, %s1946_s11  ;;  %p1951_p1 = scmp.lt.s32.totalorder %s16_s10, %s16_s10 }
   0x5   :  { %p1952_p2 = scmp.lt.s32.totalorder %s1950_s12, %s1946_s11 }
   0x7   :  { %p1953_p3 = por %p1952_p2, %p1951_p1 }
   0x9   :  { %p1954_p4 = pnand %p1953_p3, %p1947_p0 }
   0xb   :  { %1957 = shalt.err (!%p1954_p4)
}
   0xc   :  { %18 = dma.hbm_to_vmem [thread:$0]  %s3139_s0, 48, %s16_s10, [#allocation4]  }
   0xd   :  { %1966 = dma.done.wait [#allocation4], 48  }
   0xe   :  { %1967 = vsyncadd [#allocation4], 4294967248  ;;  %v33_v0 = vlaneseq  ;;  %v3171_v1 = vmov 0.0   ;;  %vm3142_vm0 = vmmov 0   ;;  %vm884_vm1 = vcmask 1040384   ;;  %s1976_s17 = smov [#allocation6]  }
   0xf   :  { %1774 = vmatprep.subr.mxu1 %v3171_v1  ;;  %1782 = vmatprep.mubr.msk.f32.mxu1 %vm3142_vm0, %v3171_v1  ;;  %v2033_v18 = vld [vmem:[%s3140_s1] sm:$0x1]  ;;  %v2035_v19 = vld [vmem:[#allocation3] sm:$0x7]  ;;  %vm425_vm2 = vcmask 261120   ;;  %v3173_v34 = vmov 1.0  }
  0x10   :  { %v1998_v2 = vand.u32 127, %v33_v0  ;;  %v2000_v3 = vshrl.u32 %v33_v0, 7  ;;  %493 = vmatprep.mubr.f32.mxu0 %v3171_v1  ;;  %v32_v25 = vcvt.s32.f32 %v2033_v18  ;;  %v3264_v58 = vmov 0 }
  0x11   :  { %v3268_v18 = vmov 0 }
  0x12   :  { %3260 = vst [vmem:[#allocation9_spill] sm:$0xff] %v1998_v2  ;;  %3261 = vst [vmem:[#allocation10_spill] sm:$0xff] %v2000_v3  ;;  %v2004_v4 = vadd.s32 128, %v1998_v2  ;;  %v2007_v5 = vcvt.s32.f32 %v1998_v2  ;;  %v56_v6 = vadd.s32 24, %v2000_v3  ;;  %v2011_v7 = vadd.s32 256, %v1998_v2 }
  0x13   :  { %v55_v8 = vadd.s32 16, %v2000_v3  ;;  %v54_v9 = vadd.s32 8, %v2000_v3  ;;  %v2016_v10 = vcvt.s32.f32 %v2000_v3  ;;  %v2019_v11 = vsub.s32 0, %v2000_v3 }
  0x14   :  { %v3170_v12 = vcvt.s32.f32 %v2004_v4  ;;  %v2022_v13 = vcvt.s32.f32 %v56_v6  ;;  %v39_v14 = vcvt.s32.f32 %v2011_v7  ;;  %v40_v15 = vmul.f32 0.083333336, %v2007_v5 }
  0x15   :  { %v2026_v16 = vcvt.s32.f32 %v55_v8  ;;  %v2028_v17 = vcvt.s32.f32 %v54_v9  ;;  %v2038_v20 = vsub.s32 1, %v2000_v3  ;;  %v2041_v21 = vsub.s32 2, %v2000_v3 }
  0x16   :  { %v41_v22 = vmul.f32 0.083333336, %v3170_v12  ;;  %v42_v23 = vmul.f32 0.083333336, %v39_v14  ;;  %v2047_v24 = vfloor.f32 %v40_v15  ;;  %v2052_v26 = vrot.slane %v2035_v19, %v2019_v11 }
  0x17   :  { %3262 = vst [vmem:[#allocation11_spill] sm:$0xff] %v2038_v20  ;;  %3263 = vst [vmem:[#allocation12_spill] sm:$0xff] %v2041_v21  ;;  %v2056_v27 = vrot.slane %v2035_v19, %v2038_v20  ;;  %v2060_v28 = vrot.slane %v2035_v19, %v2041_v21  ;;  %v100_v29 = vadd.s32 376, %v2000_v3  ;;  %v99_v38 = vadd.s32 368, %v2000_v3 }
  0x18   :  { %v2063_v30 = vfloor.f32 %v41_v22  ;;  %v2065_v31 = vfloor.f32 %v42_v23  ;;  %vm398_vm3 = vcmp.eq.f32.partialorder %v2047_v24, %v2022_v13  ;;  %vm395_vm4 = vcmp.eq.f32.partialorder %v2047_v24, %v2026_v16 }
  0x19   :  { %vm392_vm5 = vcmp.eq.f32.partialorder %v2047_v24, %v2028_v17  ;;  %vm389_vm6 = vcmp.eq.f32.partialorder %v2047_v24, %v2016_v10  ;;  %v885_v32 = vsel %vm884_vm1, %v2052_v26, -inf  ;;  %v886_v33 = vsel %vm884_vm1, %v2056_v27, -inf }
  0x1a   :  { %vm399_vm7 = vcmp.eq.f32.partialorder %v2063_v30, %v2022_v13  ;;  %vm400_vm8 = vcmp.eq.f32.partialorder %v2065_v31, %v2022_v13  ;;  %vm396_vm9 = vcmp.eq.f32.partialorder %v2063_v30, %v2026_v16  ;;  %vm397_vm10 = vcmp.eq.f32.partialorder %v2065_v31, %v2026_v16 }
  0x1b   :  { %1355 = vmatprep.subr.msk.mxu0 %vm399_vm7, %v3173_v34  ;;  %1775 = vmatpush3.msk.msra.mxu1 %vm400_vm8, %v3173_v34  ;;  %vm393_vm11 = vcmp.eq.f32.partialorder %v2063_v30, %v2028_v17  ;;  %vm394_vm12 = vcmp.eq.f32.partialorder %v2065_v31, %v2028_v17  ;;  %vm390_vm13 = vcmp.eq.f32.partialorder %v2063_v30, %v2016_v10  ;;  %v887_v35 = vsel %vm884_vm1, %v2060_v28, -inf }
  0x1c   :  { %1356 = vmatpush1.msk.msra.mxu0 %vm398_vm3, %v3173_v34  ;;  %1776 = vmatprep.subr.mxu1 %v3171_v1  ;;  %vm391_vm14 = vcmp.eq.f32.partialorder %v2065_v31, %v2016_v10  ;;  %v888_v36 = vmax.f32 %v885_v32, %v886_v33  ;;  %v148_v37 = vcvt.s32.f32 %v100_v29  ;;  %v84_v39 = vadd.s32 248, %v2000_v3 }
  0x1d   :  { %1357 = vmatprep.subr.msk.mxu0 %vm396_vm9, %v3173_v34  ;;  %1777 = vmatpush3.msk.msra.mxu1 %vm397_vm10, %v3173_v34  ;;  %v68_v40 = vadd.s32 120, %v2000_v3  ;;  %v98_v41 = vadd.s32 360, %v2000_v3  ;;  %v83_v42 = vadd.s32 240, %v2000_v3  ;;  %v147_v45 = vcvt.s32.f32 %v99_v38 }
  0x1e   :  { %1358 = vmatpush1.msk.msra.mxu0 %vm395_vm4, %v3173_v34  ;;  %1778 = vmatprep.subr.mxu1 %v3171_v1  ;;  %v889_v43 = vmax.f32 %v888_v36, %v887_v35  ;;  %v196_v44 = vmul.f32 0.083333336, %v148_v37  ;;  %v67_v46 = vadd.s32 112, %v2000_v3  ;;  %v132_v47 = vcvt.s32.f32 %v84_v39 }
  0x1f   :  { %1359 = vmatprep.subr.msk.mxu0 %vm393_vm11, %v3173_v34  ;;  %1779 = vmatpush3.msk.msra.mxu1 %vm394_vm12, %v3173_v34  ;;  %v116_v48 = vcvt.s32.f32 %v68_v40  ;;  %v146_v49 = vcvt.s32.f32 %v98_v41  ;;  %v131_v50 = vcvt.s32.f32 %v83_v42  ;;  %v195_v52 = vmul.f32 0.083333336, %v147_v45 }
  0x20   :  { %1360 = vmatpush1.msk.msra.mxu0 %vm392_vm5, %v3173_v34  ;;  %1780 = vmatprep.subr.mxu1 %v3171_v1  ;;  %v244_v51 = vfloor.f32 %v196_v44  ;;  %v115_v53 = vcvt.s32.f32 %v67_v46  ;;  %v97_v54 = vadd.s32 352, %v2000_v3  ;;  %v180_v55 = vmul.f32 0.083333336, %v132_v47 }
  0x21   :  { %1361 = vmatprep.subr.msk.mxu0 %vm390_vm13, %v3173_v34  ;;  %1781 = vmatpush3.msk.msra.mxu1 %vm391_vm14, %v3173_v34  ;;  %v164_v56 = vmul.f32 0.083333336, %v116_v48  ;;  %v194_v57 = vmul.f32 0.083333336, %v146_v49  ;;  %v243_v59 = vfloor.f32 %v195_v52  ;;  %v179_v60 = vmul.f32 0.083333336, %v131_v50 }
  0x22   :  { %1362 = vmatpush1.msk.msra.mxu0 %vm389_vm6, %v3173_v34  ;;  %1783 = vmatmul.mubr.msk.f32.vlgmr.msra.gmra.mxu1 %vm425_vm2, %v32_v25  ;;  %vm2147_vm15 = vcmp.eq.f32.partialorder %v244_v51, %v2007_v5  ;;  %v163_v61 = vmul.f32 0.083333336, %v115_v53  ;;  %v228_v62 = vfloor.f32 %v180_v55  ;;  %v145_v6 = vcvt.s32.f32 %v97_v54 }
  0x23   :  { %v3265_v58 = vsel %vm2147_vm15, 4294967295, %v3264_v58  ;;  %1363 = vmatmul.mubr.msk.f32.vlgmr.msra.gmra.mxu0 %vm425_vm2, %v32_v25  ;;  %890 = vmax.xlane.f32.xlu0 %v889_v43  ;;  %v212_v63 = vfloor.f32 %v164_v56  ;;  %v242_v0 = vfloor.f32 %v194_v57  ;;  %vm2156_vm1 = vcmp.eq.f32.partialorder %v243_v59, %v2007_v5 }
  0x24   :  { %1785 = vmatprep.subr.mxu1 %v3171_v1  ;;  %v227_v9 = vfloor.f32 %v179_v60  ;;  %v211_v15 = vfloor.f32 %v163_v61  ;;  %v82_v22 = vadd.s32 232, %v2000_v3  ;;  %1817 = vmatprep.mubr.msk.f32.mxu1 %vm3142_vm0, %v3171_v1  ;;  %vm2167_vm2 = vcmp.eq.f32.partialorder %v228_v62, %v2007_v5 }
  0x25   :  { %1786 = vmatpush3.msk.msra.mxu1 %vm2147_vm15, %v3173_v34  ;;  %v3269_v18 = vsel %vm2167_vm2, 4294967295, %v3268_v18  ;;  %vm2172_vm3 = vcmp.eq.f32.partialorder %v212_v63, %v2007_v5  ;;  %vm2177_vm4 = vcmp.eq.f32.partialorder %v242_v0, %v2007_v5  ;;  %v3273_v25 = vmov 0  ;;  %1566 = vmatprep.subr.msk.mxu0 %vm2167_vm2, %v3173_v34 }
  0x26   :  { %3270 = vst [vmem:[#allocation13_spill] sm:$0xff] %v3269_v18  ;;  %v3274_v25 = vsel %vm2177_vm4, 4294967295, %v3273_v25  ;;  %v193_v29 = vmul.f32 0.083333336, %v145_v6  ;;  %1787 = vmatprep.subr.mxu1 %v3171_v1  ;;  %vm2186_vm5 = vcmp.eq.f32.partialorder %v227_v9, %v2007_v5  ;;  %v3275_v32 = vmov 0  ;;  %1567 = vmatpush3.msk.msra.mxu0 %vm2172_vm3, %v3173_v34 }
  0x27   :  { %v3276_v32 = vsel %vm2186_vm5, 4294967295, %v3275_v32  ;;  %vm2191_vm6 = vcmp.eq.f32.partialorder %v211_v15, %v2007_v5  ;;  %v3277_v33 = vmov 0  ;;  %v130_v35 = vcvt.s32.f32 %v82_v22  ;;  %1788 = vmatpush3.msk.msra.mxu1 %vm2156_vm1, %v3173_v34  ;;  %1568 = vmatprep.subr.msk.mxu0 %vm2186_vm5, %v3173_v34 }
  0x28   :  { %v3278_v33 = vsel %vm2191_vm6, 4294967295, %v3277_v33  ;;  %v66_v36 = vadd.s32 104, %v2000_v3  ;;  %v241_v37 = vfloor.f32 %v193_v29  ;;  %v96_v38 = vadd.s32 344, %v2000_v3  ;;  %1789 = vmatprep.subr.mxu1 %v3171_v1  ;;  %1569 = vmatpush3.msk.msra.mxu0 %vm2191_vm6, %v3173_v34 }
  0x29   :  { %v81_v39 = vadd.s32 224, %v2000_v3  ;;  %v65_v40 = vadd.s32 96, %v2000_v3  ;;  %v178_v41 = vmul.f32 0.083333336, %v130_v35  ;;  %v95_v43 = vadd.s32 336, %v2000_v3  ;;  %1790 = vmatpush3.msk.msra.mxu1 %vm2177_vm4, %v3173_v34 }
  0x2a   :  { %v114_v42 = vcvt.s32.f32 %v66_v36  ;;  %v80_v44 = vadd.s32 216, %v2000_v3  ;;  %vm2218_vm7 = vcmp.eq.f32.partialorder %v241_v37, %v2007_v5  ;;  %v3279_v45 = vmov 0  ;;  %1791 = vmatprep.subr.mxu1 %v3171_v1 }
  0x2b   :  { %v3280_v45 = vsel %vm2218_vm7, 4294967295, %v3279_v45  ;;  %v144_v46 = vcvt.s32.f32 %v96_v38  ;;  %v129_v47 = vcvt.s32.f32 %v81_v39  ;;  %v113_v48 = vcvt.s32.f32 %v65_v40  ;;  %1792 = vmatpush3.msk.msra.mxu1 %vm2218_vm7, %v3173_v34 }
  0x2c   :  { %v226_v49 = vfloor.f32 %v178_v41  ;;  %v162_v50 = vmul.f32 0.083333336, %v114_v42  ;;  %v143_v51 = vcvt.s32.f32 %v95_v43  ;;  %v128_v52 = vcvt.s32.f32 %v80_v44  ;;  %1793 = vmatprep.subr.mxu1 %v3171_v1 }
  0x2d   :  { %v192_v53 = vmul.f32 0.083333336, %v144_v46  ;;  %v177_v54 = vmul.f32 0.083333336, %v129_v47  ;;  %v161_v55 = vmul.f32 0.083333336, %v113_v48 }
  0x2e   :  { %vm2227_vm8 = vcmp.eq.f32.partialorder %v226_v49, %v2007_v5  ;;  %v3281_v56 = vmov 0  ;;  %v210_v57 = vfloor.f32 %v162_v50  ;;  %v191_v59 = vmul.f32 0.083333336, %v143_v51 }
  0x2f   :  { %v3282_v56 = vsel %vm2227_vm8, 4294967295, %v3281_v56  ;;  %v176_v60 = vmul.f32 0.083333336, %v128_v52  ;;  %1570 = vmatprep.subr.msk.mxu0 %vm2227_vm8, %v3173_v34  ;;  %v240_v61 = vfloor.f32 %v192_v53  ;;  %v225_v62 = vfloor.f32 %v177_v54 }
  0x30   :  { %v209_v63 = vfloor.f32 %v161_v55  ;;  %v64_v0 = vadd.s32 88, %v2000_v3  ;;  %vm2237_vm9 = vcmp.eq.f32.partialorder %v210_v57, %v2007_v5  ;;  %v3283_v6 = vmov 0 }
  0x31   :  { %v3284_v6 = vsel %vm2237_vm9, 4294967295, %v3283_v6  ;;  %v239_v9 = vfloor.f32 %v191_v59  ;;  %v224_v15 = vfloor.f32 %v176_v60  ;;  %v94_v22 = vadd.s32 328, %v2000_v3  ;;  %1571 = vmatpush3.msk.msra.mxu0 %vm2237_vm9, %v3173_v34 }
  0x32   :  { %vm2246_vm10 = vcmp.eq.f32.partialorder %v240_v61, %v2007_v5  ;;  %v3285_v29 = vmov 0  ;;  %vm2251_vm11 = vcmp.eq.f32.partialorder %v225_v62, %v2007_v5  ;;  %v3287_v35 = vmov 0 }
  0x33   :  { %v3286_v29 = vsel %vm2246_vm10, 4294967295, %v3285_v29  ;;  %v3288_v35 = vsel %vm2251_vm11, 4294967295, %v3287_v35  ;;  %vm2256_vm12 = vcmp.eq.f32.partialorder %v209_v63, %v2007_v5  ;;  %v3289_v36 = vmov 0  ;;  %1794 = vmatpush3.msk.msra.mxu1 %vm2246_vm10, %v3173_v34  ;;  %1572 = vmatprep.subr.msk.mxu0 %vm2251_vm11, %v3173_v34 }
  0x34   :  { %v3290_v36 = vsel %vm2256_vm12, 4294967295, %v3289_v36  ;;  %v112_v37 = vcvt.s32.f32 %v64_v0  ;;  %vm2267_vm13 = vcmp.eq.f32.partialorder %v239_v9, %v2007_v5  ;;  %v3291_v38 = vmov 0  ;;  %1795 = vmatprep.subr.mxu1 %v3171_v1  ;;  %1573 = vmatpush3.msk.msra.mxu0 %vm2256_vm12, %v3173_v34 }
  0x35   :  { %v3292_v38 = vsel %vm2267_vm13, 4294967295, %v3291_v38  ;;  %vm2272_vm14 = vcmp.eq.f32.partialorder %v224_v15, %v2007_v5  ;;  %v3293_v39 = vmov 0  ;;  %v142_v40 = vcvt.s32.f32 %v94_v22  ;;  %1796 = vmatpush3.msk.msra.mxu1 %vm2267_vm13, %v3173_v34 }
  0x36   :  { %v3294_v39 = vsel %vm2272_vm14, 4294967295, %v3293_v39  ;;  %v79_v41 = vadd.s32 208, %v2000_v3  ;;  %v160_v42 = vmul.f32 0.083333336, %v112_v37  ;;  %v63_v43 = vadd.s32 80, %v2000_v3  ;;  %1574 = vmatprep.subr.msk.mxu0 %vm2272_vm14, %v3173_v34  ;;  %1797 = vmatprep.subr.mxu1 %v3171_v1 }
  0x37   :  { %v93_v44 = vadd.s32 320, %v2000_v3  ;;  %v78_v46 = vadd.s32 200, %v2000_v3  ;;  %v190_v47 = vmul.f32 0.083333336, %v142_v40  ;;  %v62_v49 = vadd.s32 72, %v2000_v3 }
  0x38   :  { %v127_v48 = vcvt.s32.f32 %v79_v41  ;;  %v92_v50 = vadd.s32 312, %v2000_v3  ;;  %v208_v51 = vfloor.f32 %v160_v42  ;;  %v111_v52 = vcvt.s32.f32 %v63_v43 }
  0x39   :  { %v141_v53 = vcvt.s32.f32 %v93_v44  ;;  %v126_v54 = vcvt.s32.f32 %v78_v46  ;;  %v238_v55 = vfloor.f32 %v190_v47  ;;  %v110_v59 = vcvt.s32.f32 %v62_v49 }
  0x3a   :  { %v175_v57 = vmul.f32 0.083333336, %v127_v48  ;;  %v140_v60 = vcvt.s32.f32 %v92_v50  ;;  %vm2294_vm0 = vcmp.eq.f32.partialorder %v208_v51, %v2007_v5  ;;  %v3295_v61 = vmov 0 }
  0x3b   :  { %v3296_v61 = vsel %vm2294_vm0, 4294967295, %v3295_v61  ;;  %v159_v62 = vmul.f32 0.083333336, %v111_v52  ;;  %v189_v63 = vmul.f32 0.083333336, %v141_v53  ;;  %1575 = vmatpush3.msk.msra.mxu0 %vm2294_vm0, %v3173_v34  ;;  %vm2302_vm14 = vcmp.eq.f32.partialorder %v238_v55, %v2007_v5 }
  0x3c   :  { %v174_v0 = vmul.f32 0.083333336, %v126_v54  ;;  %v3297_v9 = vmov 0  ;;  %v223_v15 = vfloor.f32 %v175_v57  ;;  %v158_v22 = vmul.f32 0.083333336, %v110_v59  ;;  %1798 = vmatpush3.msk.msra.mxu1 %vm2302_vm14, %v3173_v34 }
  0x3d   :  { %v3298_v9 = vsel %vm2302_vm14, 4294967295, %v3297_v9  ;;  %v188_v37 = vmul.f32 0.083333336, %v140_v60  ;;  %v207_v40 = vfloor.f32 %v159_v62  ;;  %v237_v41 = vfloor.f32 %v189_v63  ;;  %1799 = vmatprep.subr.mxu1 %v3171_v1 }
  0x3e   :  { %v222_v42 = vfloor.f32 %v174_v0  ;;  %v77_v43 = vadd.s32 192, %v2000_v3  ;;  %vm2311_vm13 = vcmp.eq.f32.partialorder %v223_v15, %v2007_v5  ;;  %v3299_v44 = vmov 0 }
  0x3f   :  { %v3300_v44 = vsel %vm2311_vm13, 4294967295, %v3299_v44  ;;  %v206_v46 = vfloor.f32 %v158_v22  ;;  %v236_v47 = vfloor.f32 %v188_v37  ;;  %v61_v48 = vadd.s32 64, %v2000_v3  ;;  %1576 = vmatprep.subr.msk.mxu0 %vm2311_vm13, %v3173_v34 }
  0x40   :  { %vm2321_vm14 = vcmp.eq.f32.partialorder %v207_v40, %v2007_v5  ;;  %v3301_v49 = vmov 0  ;;  %vm2326_vm0 = vcmp.eq.f32.partialorder %v237_v41, %v2007_v5  ;;  %v3303_v50 = vmov 0 }
  0x41   :  { %v3302_v49 = vsel %vm2321_vm14, 4294967295, %v3301_v49  ;;  %v3304_v50 = vsel %vm2326_vm0, 4294967295, %v3303_v50  ;;  %vm2331_vm12 = vcmp.eq.f32.partialorder %v222_v42, %v2007_v5  ;;  %v3305_v51 = vmov 0  ;;  %1577 = vmatpush3.msk.msra.mxu0 %vm2321_vm14, %v3173_v34  ;;  %1800 = vmatpush3.msk.msra.mxu1 %vm2326_vm0, %v3173_v34 }
  0x42   :  { %v3306_v51 = vsel %vm2331_vm12, 4294967295, %v3305_v51  ;;  %v125_v52 = vcvt.s32.f32 %v77_v43  ;;  %vm2342_vm13 = vcmp.eq.f32.partialorder %v206_v46, %v2007_v5  ;;  %v3307_v53 = vmov 0  ;;  %1578 = vmatprep.subr.msk.mxu0 %vm2331_vm12, %v3173_v34  ;;  %1801 = vmatprep.subr.mxu1 %v3171_v1 }
  0x43   :  { %v3308_v53 = vsel %vm2342_vm13, 4294967295, %v3307_v53  ;;  %vm2347_vm11 = vcmp.eq.f32.partialorder %v236_v47, %v2007_v5  ;;  %v3309_v54 = vmov 0  ;;  %v109_v55 = vcvt.s32.f32 %v61_v48  ;;  %1579 = vmatpush3.msk.msra.mxu0 %vm2342_vm13, %v3173_v34 }
  0x44   :  { %v3310_v54 = vsel %vm2347_vm11, 4294967295, %v3309_v54  ;;  %v91_v57 = vadd.s32 304, %v2000_v3  ;;  %v173_v59 = vmul.f32 0.083333336, %v125_v52  ;;  %v76_v60 = vadd.s32 184, %v2000_v3  ;;  %1802 = vmatpush3.msk.msra.mxu1 %vm2347_vm11, %v3173_v34 }
  0x45   :  { %v60_v62 = vadd.s32 56, %v2000_v3  ;;  %v90_v63 = vadd.s32 296, %v2000_v3  ;;  %v157_v0 = vmul.f32 0.083333336, %v109_v55  ;;  %v48_v22 = vmul.f32 12.0, %v2065_v31  ;;  %1803 = vmatprep.subr.mxu1 %v3171_v1 }
  0x46   :  { %v139_v15 = vcvt.s32.f32 %v91_v57  ;;  %v221_v37 = vfloor.f32 %v173_v59  ;;  %v124_v40 = vcvt.s32.f32 %v76_v60  ;;  %v3311_v48 = vmov 0 }
  0x47   :  { %v108_v41 = vcvt.s32.f32 %v60_v62  ;;  %v138_v42 = vcvt.s32.f32 %v90_v63  ;;  %v205_v43 = vfloor.f32 %v157_v0  ;;  %v2369_v47 = vsub.f32 %v39_v14, %v48_v22 }
  0x48   :  { %v187_v46 = vmul.f32 0.083333336, %v139_v15  ;;  %vm2372_vm13 = vcmp.eq.f32.partialorder %v221_v37, %v2007_v5  ;;  %v172_v52 = vmul.f32 0.083333336, %v124_v40  ;;  %v3313_v57 = vmov 0 }
  0x49   :  { %v3312_v48 = vsel %vm2372_vm13, 4294967295, %v3311_v48  ;;  %v156_v55 = vmul.f32 0.083333336, %v108_v41  ;;  %v186_v31 = vmul.f32 0.083333336, %v138_v42  ;;  %1580 = vmatprep.subr.msk.mxu0 %vm2372_vm13, %v3173_v34  ;;  %vm2380_vm11 = vcmp.eq.f32.partialorder %v205_v43, %v2007_v5 }
  0x4a   :  { %v3314_v57 = vsel %vm2380_vm11, 4294967295, %v3313_v57  ;;  %v235_v7 = vfloor.f32 %v187_v46  ;;  %1581 = vmatpush3.msk.msra.mxu0 %vm2380_vm11, %v3173_v34  ;;  %v220_v14 = vfloor.f32 %v172_v52  ;;  %v3315_v62 = vmov 0 }
  0x4b   :  { %v204_v59 = vfloor.f32 %v156_v55  ;;  %v234_v60 = vfloor.f32 %v186_v31  ;;  %v3317_v63 = vmov 0  ;;  %v3319_v0 = vmov 0 }
  0x4c   :  { %vm2388_vm12 = vcmp.eq.f32.partialorder %v235_v7, %v2007_v5  ;;  %vm2396_vm13 = vcmp.eq.f32.partialorder %v220_v14, %v2007_v5  ;;  %v3322_v15 = vmov 0  ;;  %v75_v22 = vadd.s32 176, %v2000_v3 }
  0x4d   :  { %v3316_v62 = vsel %vm2388_vm12, 4294967295, %v3315_v62  ;;  %1804 = vmatpush3.msk.msra.mxu1 %vm2388_vm12, %v3173_v34  ;;  %v3318_v63 = vsel %vm2396_vm13, 4294967295, %v3317_v63  ;;  %vm2401_vm0 = vcmp.eq.f32.partialorder %v204_v59, %v2007_v5  ;;  %vm2406_vm11 = vcmp.eq.f32.partialorder %v234_v60, %v2007_v5  ;;  %1582 = vmatprep.subr.msk.mxu0 %vm2396_vm13, %v3173_v34 }
  0x4e   :  { %v3320_v0 = vsel %vm2401_vm0, 4294967295, %v3319_v0  ;;  %v3323_v15 = vsel %vm2406_vm11, 4294967295, %v3322_v15  ;;  %1805 = vmatprep.subr.mxu1 %v3171_v1  ;;  %1583 = vmatpush3.msk.msra.mxu0 %vm2401_vm0, %v3173_v34  ;;  %v59_v37 = vadd.s32 48, %v2000_v3  ;;  %v89_v40 = vadd.s32 288, %v2000_v3 }
  0x4f   :  { %3321 = vst [vmem:[#allocation14_spill] sm:$0xff] %v3320_v0  ;;  %3324 = vst [vmem:[#allocation15_spill] sm:$0xff] %v3323_v15  ;;  %1806 = vmatpush3.msk.msra.mxu1 %vm2406_vm11, %v3173_v34  ;;  %v123_v41 = vcvt.s32.f32 %v75_v22  ;;  %v74_v42 = vadd.s32 168, %v2000_v3  ;;  %v58_v52 = vadd.s32 40, %v2000_v3  ;;  %v88_v55 = vadd.s32 280, %v2000_v3 }
  0x50   :  { %1807 = vmatprep.subr.mxu1 %v3171_v1  ;;  %v107_v43 = vcvt.s32.f32 %v59_v37  ;;  %v137_v46 = vcvt.s32.f32 %v89_v40  ;;  %v73_v14 = vadd.s32 160, %v2000_v3  ;;  %v57_v37 = vadd.s32 32, %v2000_v3 }
  0x51   :  { %v171_v31 = vmul.f32 0.083333336, %v123_v41  ;;  %v122_v7 = vcvt.s32.f32 %v74_v42  ;;  %v106_v12 = vcvt.s32.f32 %v58_v52  ;;  %v136_v1 = vcvt.s32.f32 %v88_v55 }
  0x52   :  { %v155_v59 = vmul.f32 0.083333336, %v107_v43  ;;  %v185_v60 = vmul.f32 0.083333336, %v137_v46  ;;  %v121_v21 = vcvt.s32.f32 %v73_v14  ;;  %v3325_v40 = vmov 0 }
  0x53   :  { %v219_v34 = vfloor.f32 %v171_v31  ;;  %v170_v2 = vmul.f32 0.083333336, %v122_v7  ;;  %v154_v0 = vmul.f32 0.083333336, %v106_v12  ;;  %v184_v42 = vmul.f32 0.083333336, %v136_v1 }
  0x54   :  { %v203_v22 = vfloor.f32 %v155_v59  ;;  %v233_v15 = vfloor.f32 %v185_v60  ;;  %v169_v20 = vmul.f32 0.083333336, %v121_v21  ;;  %v3327_v43 = vmov 1.0  }
  0x55   :  { %vm2430_vm11 = vcmp.eq.f32.partialorder %v219_v34, %v2007_v5  ;;  %v218_v41 = vfloor.f32 %v170_v2  ;;  %v3328_v46 = vmov 0  ;;  %v3330_v12 = vmov 0 }
  0x56   :  { %v3326_v40 = vsel %vm2430_vm11, 4294967295, %v3325_v40  ;;  %1584 = vmatprep.subr.msk.mxu0 %vm2430_vm11, %v3327_v43  ;;  %vm2438_vm0 = vcmp.eq.f32.partialorder %v203_v22, %v2007_v5  ;;  %vm2443_vm13 = vcmp.eq.f32.partialorder %v233_v15, %v2007_v5  ;;  %v3332_v1 = vmov 0 }
  0x57   :  { %v3329_v46 = vsel %vm2438_vm0, 4294967295, %v3328_v46  ;;  %v3331_v12 = vsel %vm2443_vm13, 4294967295, %v3330_v12  ;;  %1585 = vmatpush3.msk.msra.mxu0 %vm2438_vm0, %v3327_v43  ;;  %1808 = vmatpush3.msk.msra.mxu1 %vm2443_vm13, %v3327_v43  ;;  %vm2454_vm11 = vcmp.eq.f32.partialorder %v218_v41, %v2007_v5  ;;  %v202_v2 = vfloor.f32 %v154_v0 }
  0x58   :  { %v3333_v1 = vsel %vm2454_vm11, 4294967295, %v3332_v1  ;;  %v232_v21 = vfloor.f32 %v184_v42  ;;  %1586 = vmatprep.subr.msk.mxu0 %vm2454_vm11, %v3327_v43  ;;  %v3334_v34 = vmov 0.0   ;;  %v217_v15 = vfloor.f32 %v169_v20 }
  0x59   :  { %1809 = vmatprep.subr.mxu1 %v3334_v34  ;;  %v105_v52 = vcvt.s32.f32 %v57_v37  ;;  %v87_v55 = vadd.s32 272, %v2000_v3  ;;  %vm2464_vm0 = vcmp.eq.f32.partialorder %v202_v2, %v2007_v5  ;;  %v3335_v31 = vmov 0 }
  0x5a   :  { %v3336_v31 = vsel %vm2464_vm0, 4294967295, %v3335_v31  ;;  %vm2469_vm13 = vcmp.eq.f32.partialorder %v232_v21, %v2007_v5  ;;  %v3338_v7 = vmov 0  ;;  %v72_v0 = vadd.s32 152, %v2000_v3  ;;  %1587 = vmatpush3.msk.msra.mxu0 %vm2464_vm0, %v3327_v43 }
  0x5b   :  { %3337 = vst [vmem:[#allocation16_spill] sm:$0xff] %v3336_v31  ;;  %v3339_v7 = vsel %vm2469_vm13, 4294967295, %v3338_v7  ;;  %v152_v14 = vmul.f32 0.083333336, %v2022_v13  ;;  %1810 = vmatpush3.msk.msra.mxu1 %vm2469_vm13, %v3327_v43  ;;  %vm2482_vm11 = vcmp.eq.f32.partialorder %v217_v15, %v2007_v5  ;;  %v3341_v20 = vmov 0 }
  0x5c   :  { %3340 = vst [vmem:[#allocation17_spill] sm:$0xff] %v3339_v7  ;;  %v3342_v20 = vsel %vm2482_vm11, 4294967295, %v3341_v20  ;;  %v153_v59 = vmul.f32 0.083333336, %v105_v52  ;;  %v135_v60 = vcvt.s32.f32 %v87_v55  ;;  %v86_v22 = vadd.s32 264, %v2000_v3  ;;  %1588 = vmatprep.subr.msk.mxu0 %vm2482_vm11, %v3327_v43  ;;  %1811 = vmatprep.subr.mxu1 %v3334_v34 }
  0x5d   :  { %3343 = vst [vmem:[#allocation18_spill] sm:$0xff] %v3342_v20  ;;  %v120_v13 = vcvt.s32.f32 %v72_v0  ;;  %v200_v37 = vfloor.f32 %v152_v14  ;;  %v71_v41 = vadd.s32 144, %v2000_v3  ;;  %v151_v42 = vmul.f32 0.083333336, %v2026_v16 }
  0x5e   :  { %v201_v2 = vfloor.f32 %v153_v59  ;;  %v183_v21 = vmul.f32 0.083333336, %v135_v60  ;;  %v134_v15 = vcvt.s32.f32 %v86_v22  ;;  %v85_v52 = vadd.s32 256, %v2000_v3 }
  0x5f   :  { %v168_v55 = vmul.f32 0.083333336, %v120_v13  ;;  %vm2495_vm13 = vcmp.eq.f32.partialorder %v200_v37, %v2007_v5  ;;  %v3344_v7 = vmov 0  ;;  %v119_v20 = vcvt.s32.f32 %v71_v41 }
  0x60   :  { %v3345_v7 = vsel %vm2495_vm13, 4294967295, %v3344_v7  ;;  %v199_v31 = vfloor.f32 %v151_v42  ;;  %vm2500_vm11 = vcmp.eq.f32.partialorder %v201_v2, %v2007_v5  ;;  %v3346_v0 = vmov 0 }
  0x61   :  { %v3347_v0 = vsel %vm2500_vm11, 4294967295, %v3346_v0  ;;  %v231_v14 = vfloor.f32 %v183_v21  ;;  %v182_v16 = vmul.f32 0.083333336, %v134_v15  ;;  %v133_v59 = vcvt.s32.f32 %v85_v52  ;;  %1589 = vmatpush3.msk.msra.mxu0 %vm2500_vm11, %v3327_v43 }
  0x62   :  { %v216_v60 = vfloor.f32 %v168_v55  ;;  %v167_v22 = vmul.f32 0.083333336, %v119_v20  ;;  %vm2508_vm0 = vcmp.eq.f32.partialorder %v199_v31, %v2007_v5  ;;  %v3348_v13 = vmov 0 }
  0x63   :  { %v3349_v13 = vsel %vm2508_vm0, 4294967295, %v3348_v13  ;;  %v70_v37 = vadd.s32 136, %v2000_v3  ;;  %vm2514_vm12 = vcmp.eq.f32.partialorder %v231_v14, %v2007_v5  ;;  %v3350_v41 = vmov 0 }
  0x64   :  { %v3351_v41 = vsel %vm2514_vm12, 4294967295, %v3350_v41  ;;  %v230_v42 = vfloor.f32 %v182_v16  ;;  %v181_v2 = vmul.f32 0.083333336, %v133_v59  ;;  %v150_v21 = vmul.f32 0.083333336, %v2028_v17  ;;  %1812 = vmatpush3.msk.msra.mxu1 %vm2514_vm12, %v3327_v43 }
  0x65   :  { %vm2523_vm11 = vcmp.eq.f32.partialorder %v216_v60, %v2007_v5  ;;  %v3352_v31 = vmov 0  ;;  %v215_v20 = vfloor.f32 %v167_v22  ;;  %v118_v15 = vcvt.s32.f32 %v70_v37  ;;  %1813 = vmatprep.subr.mxu1 %v3334_v34 }
  0x66   :  { %v3353_v31 = vsel %vm2523_vm11, 4294967295, %v3352_v31  ;;  %v69_v52 = vadd.s32 128, %v2000_v3  ;;  %1590 = vmatprep.subr.msk.mxu0 %vm2523_vm11, %v3327_v43  ;;  %vm2533_vm14 = vcmp.eq.f32.partialorder %v230_v42, %v2007_v5  ;;  %v3354_v17 = vmov 0 }
  0x67   :  { %v3355_v17 = vsel %vm2533_vm14, 4294967295, %v3354_v17  ;;  %v229_v55 = vfloor.f32 %v181_v2  ;;  %v198_v14 = vfloor.f32 %v150_v21  ;;  %v149_v16 = vmul.f32 0.083333336, %v2016_v10  ;;  %1591 = vmatpush3.msk.msra.mxu0 %vm2495_vm13, %v3327_v43  ;;  %1814 = vmatpush3.msk.msra.mxu1 %vm2533_vm14, %v3327_v43 }
  0x68   :  { %vm2545_vm11 = vcmp.eq.f32.partialorder %v215_v20, %v2007_v5  ;;  %v3356_v59 = vmov 0  ;;  %v166_v60 = vmul.f32 0.083333336, %v118_v15  ;;  %v117_v22 = vcvt.s32.f32 %v69_v52  ;;  %1815 = vmatprep.subr.mxu1 %v3334_v34 }
  0x69   :  { %v3357_v59 = vsel %vm2545_vm11, 4294967295, %v3356_v59  ;;  %1592 = vmatprep.subr.msk.mxu0 %vm2545_vm11, %v3327_v43  ;;  %vm2554_vm12 = vcmp.eq.f32.partialorder %v229_v55, %v2007_v5  ;;  %v3358_v10 = vmov 0  ;;  %v197_v37 = vfloor.f32 %v149_v16 }
  0x6a   :  { %v3359_v10 = vsel %vm2554_vm12, 4294967295, %v3358_v10  ;;  %1593 = vmatpush3.msk.msra.mxu0 %vm2508_vm0, %v3327_v43  ;;  %1816 = vmatpush3.msk.msra.mxu1 %vm2554_vm12, %v3327_v43  ;;  %v214_v42 = vfloor.f32 %v166_v60  ;;  %v165_v2 = vmul.f32 0.083333336, %v117_v22  ;;  %vm2566_vm11 = vcmp.eq.f32.partialorder %v198_v14, %v2007_v5 }
  0x6b   :  { %1820 = vmatprep.subr.mxu1 %v3334_v34  ;;  %v3360_v21 = vmov 0  ;;  %v3363_v20 = vmov 0  ;;  %vm2579_vm12 = vcmp.eq.f32.partialorder %v197_v37, %v2007_v5  ;;  %v3365_v52 = vmov 0 }
  0x6c   :  { %v3361_v21 = vsel %vm2566_vm11, 4294967295, %v3360_v21  ;;  %vm2571_vm14 = vcmp.eq.f32.partialorder %v214_v42, %v2007_v5  ;;  %v213_v15 = vfloor.f32 %v165_v2  ;;  %v3366_v52 = vsel %vm2579_vm12, 4294967295, %v3365_v52 }
  0x6d   :  { %3362 = vst [vmem:[#allocation19_spill] sm:$0xff] %v3361_v21  ;;  %v3364_v20 = vsel %vm2571_vm14, 4294967295, %v3363_v20  ;;  %1594 = vmatprep.subr.msk.mxu0 %vm2571_vm14, %v3327_v43  ;;  %3367 = vst [vmem:[#allocation20_spill] sm:$0xff] %v3366_v52  ;;  %v3368_v55 = vmov 0  ;;  %v46_v14 = vmul.f32 12.0, %v2047_v24  ;;  %v47_v16 = vmul.f32 12.0, %v2063_v30 }
  0x6e   :  { %1595 = vmatpush3.msk.msra.mxu0 %vm2566_vm11, %v3327_v43  ;;  %vm2587_vm0 = vcmp.eq.f32.partialorder %v213_v15, %v2007_v5  ;;  %v3371_v37 = vcvt.s32.f32 %v2004_v4  ;;  %v1974_v52 = vmov 0.009090909  }
  0x6f   :  { %v3369_v55 = vsel %vm2587_vm0, 4294967295, %v3368_v55  ;;  %1596 = vmatprep.subr.msk.mxu0 %vm2587_vm0, %v3327_v43  ;;  %v49_v60 = vsub.f32 %v2007_v5, %v46_v14 }
  0x70   :  { %3370 = vst [vmem:[#allocation21_spill] sm:$0xff] %v3369_v55  ;;  %1597 = vmatpush3.msk.msra.mxu0 %vm2579_vm12, %v3327_v43  ;;  %v50_v42 = vsub.f32 %v3371_v37, %v47_v16 }
  0x71   :  { %1618 = vmatprep.subr.msk.mxu0 %vm2167_vm2, %v3327_v43 }
  0xac   :  { %v2605_v2 = vpop.xlane.xlu0 %890 }
  0xad   :  { %v896_v5 = vrot.slane %v2605_v2, %v2019_v11 }
  0xe2   :  { %v566_v22 = vpop.f32.mrf.mxu1 }
  0xe3   :  { %vm572_vm0 = vcmp.eq.f32.partialorder %v2369_v47, %v566_v22  ;;  %v495_v15 = vpop.f32.mrf.mxu0 }
  0xe4   :  { %v575_v55 = vsel %vm572_vm0, 0.9, %v1974_v52  ;;  %vm570_vm12 = vcmp.eq.f32.partialorder %v49_v60, %v495_v15  ;;  %v1784_v18 = vpop.f32.mrf.mxu1  ;;  %v898_v60 = vsub.f32 %v2035_v19, %v896_v5  ;;  %vm3372_vm0 = vmmov 0   ;;  %v3398_v5 = vld [vmem:[#allocation12_spill] sm:$0xff] }
  0xe5   :  { %v594_v21 = vmul.f32 %v2060_v28, %v575_v55  ;;  %v573_v24 = vsel %vm570_vm12, 0.9, %v1974_v52  ;;  %v497_v3 = vpop.f32.mrf.mxu0  ;;  %vm3374_vm12 = vnez %v3290_v36 }
  0xe6   :  { %v592_v30 = vmul.f32 %v2052_v26, %v573_v24  ;;  %vm571_vm2 = vcmp.eq.f32.partialorder %v50_v42, %v497_v3  ;;  %v899_v15 = vmul.f32 1.442695, %v898_v60  ;;  %v3390_v42 = vld [vmem:[#allocation14_spill] sm:$0xff]  ;;  %v3392_v24 = vld [vmem:[#allocation15_spill] sm:$0xff]  ;;  %v3399_v60 = vld [vmem:[#allocation16_spill] sm:$0xff] }
  0xe7   :  { %v597_v4 = vpack.c.bf16 %v594_v21, %v594_v21  ;;  %v574_v14 = vsel %vm571_vm2, 0.9, %v1974_v52  ;;  %vm3373_vm2 = vnez %v3288_v35 }
  0xe8   :  { %v595_v16 = vpack.c.bf16 %v592_v30, %v592_v30  ;;  %v593_v47 = vmul.f32 %v2056_v27, %v574_v14  ;;  %1934 = vpow2.f32 %v899_v15 }
  0xe9   :  { %v2613_v22 = vunpack.c.l.bf16 %v597_v4 }
  0xea   :  { %v596_v18 = vpack.c.bf16 %v593_v47, %v593_v47  ;;  %v2617_v55 = vunpack.c.l.bf16 %v595_v16  ;;  %v1975_v16 = vmov 1966171168  }
  0xeb   :  { %v603_v28 = vsub.f32 %v594_v21, %v2613_v22  ;;  %v3389_v21 = vld [vmem:[#allocation11_spill] sm:$0xff] }
  0xec   :  { %v599_v37 = vunpack.c.l.bf16 %v596_v18  ;;  %v601_v26 = vsub.f32 %v592_v30, %v2617_v55  ;;  %v3401_v18 = vld [vmem:[#allocation17_spill] sm:$0xff] }
  0xed   :  { %1818 = vmatmul.mubr.f32.vlgmr.msra.gmra.mxu1 %v603_v28  ;;  %v3403_v28 = vld [vmem:[#allocation18_spill] sm:$0xff] }
  0xee   :  { %1821 = vmatpush3.msk.msra.mxu1 %vm2147_vm15, %v3327_v43  ;;  %v602_v3 = vsub.f32 %v593_v47, %v599_v37  ;;  %1852 = vmatprep.mubr.msk.f32.mxu1 %vm3372_vm0, %v3334_v34  ;;  %vm3375_vm0 = vnez %v3292_v38  ;;  %v928_v47 = vunpack.c.l.s4 %v1975_v16  ;;  %v3414_v16 = vld [vmem:[#allocation21_spill] sm:$0xff] }
  0xef   :  { %1822 = vmatprep.subr.mxu1 %v3334_v34 }
  0xf0   :  { %1823 = vmatpush3.msk.msra.mxu1 %vm2156_vm1, %v3327_v43  ;;  %668 = vmatprep.mubr.f32.mxu0 %v602_v3 }
  0xf1   :  { %1824 = vmatprep.subr.mxu1 %v3334_v34  ;;  %669 = vmatmul.mubr.f32.vlgmr.msra.gmra.mxu0 %v601_v26  ;;  %v929_v26 = vunpack.c.0.s8 %v928_v47  ;;  %v3416_v47 = vld [vmem:[#allocation20_spill] sm:$0xff] }
  0xf2   :  { %1619 = vmatpush3.msk.msra.mxu0 %vm2172_vm3, %v3327_v43  ;;  %1825 = vmatpush3.msk.msra.mxu1 %vm2177_vm4, %v3327_v43 }
  0xf3   :  { %1620 = vmatprep.subr.msk.mxu0 %vm2186_vm5, %v3327_v43  ;;  %808 = vmatprep.mubr.f32.mxu0 %v599_v37 }
  0xf4   :  { %1826 = vmatprep.subr.mxu1 %v3334_v34  ;;  %1621 = vmatpush3.msk.msra.mxu0 %vm2191_vm6, %v3327_v43 }
  0xf5   :  { %1827 = vmatpush3.msk.msra.mxu1 %vm2218_vm7, %v3327_v43  ;;  %1622 = vmatprep.subr.msk.mxu0 %vm2227_vm8, %v3327_v43  ;;  %v2689_v19 = vpop.eup %1934 }
  0xf6   :  { %1828 = vmatprep.subr.mxu1 %v3334_v34  ;;  %1623 = vmatpush3.msk.msra.mxu0 %vm2237_vm9, %v3327_v43  ;;  %vm3376_vm9 = vnez %v3294_v39  ;;  %v905_v27 = vrot.slane %v2689_v19, %v2019_v11  ;;  %v909_v52 = vrot.slane %v2689_v19, %v3389_v21  ;;  %v913_v30 = vrot.slane %v2689_v19, %v3398_v5 }
  0xf7   :  { %1829 = vmatpush3.msk.msra.mxu1 %vm2246_vm10, %v3327_v43  ;;  %1624 = vmatprep.subr.msk.mxu0 %vm3373_vm2, %v3327_v43  ;;  %vm3377_vm10 = vnez %v3296_v61  ;;  %vm3378_vm2 = vnez %v3298_v9 }
  0xf8   :  { %1830 = vmatprep.subr.mxu1 %v3334_v34  ;;  %1625 = vmatpush3.msk.msra.mxu0 %vm3374_vm12, %v3327_v43  ;;  %vm3379_vm12 = vnez %v3300_v44  ;;  %v917_v4 = vpack.c.bf16 %v905_v27, %v905_v27  ;;  %v918_v14 = vpack.c.bf16 %v909_v52, %v909_v52  ;;  %v919_v37 = vpack.c.bf16 %v913_v30, %v913_v30  ;;  %v3412_v30 = vld [vmem:[#allocation10_spill] sm:$0xff] }
  0xf9   :  { %1831 = vmatpush3.msk.msra.mxu1 %vm3375_vm0, %v3327_v43  ;;  %1626 = vmatprep.subr.msk.mxu0 %vm3376_vm9, %v3327_v43  ;;  %vm3380_vm0 = vnez %v3302_v49  ;;  %vm3381_vm9 = vnez %v3304_v50 }
  0xfa   :  { %1832 = vmatprep.subr.mxu1 %v3334_v34  ;;  %1627 = vmatpush3.msk.msra.mxu0 %vm3377_vm10, %v3327_v43  ;;  %vm3382_vm10 = vnez %v3306_v51  ;;  %v2757_v15 = vunpack.c.l.bf16 %v917_v4  ;;  %v2759_v3 = vunpack.c.l.bf16 %v918_v14  ;;  %v2781_v27 = vunpack.c.l.bf16 %v919_v37 }
  0xfb   :  { %1833 = vmatpush3.msk.msra.mxu1 %vm3378_vm2, %v3327_v43  ;;  %1628 = vmatprep.subr.msk.mxu0 %vm3379_vm12, %v3327_v43  ;;  %vm3383_vm12 = vnez %v3308_v53  ;;  %vm3384_vm2 = vnez %v3310_v54  ;;  %v932_v4 = vsub.s32 %v929_v26, %v3412_v30  ;;  %v3418_v26 = vld [vmem:[#allocation13_spill] sm:$0xff] }
  0xfc   :  { %1834 = vmatprep.subr.mxu1 %v3334_v34  ;;  %1629 = vmatpush3.msk.msra.mxu0 %vm3380_vm0, %v3327_v43  ;;  %vm3385_vm0 = vnez %v3312_v48  ;;  %v926_v52 = vcombine.low %v2757_v15, %v2759_v3 }
  0xfd   :  { %1835 = vmatpush3.msk.msra.mxu1 %vm3381_vm9, %v3327_v43  ;;  %1630 = vmatprep.subr.msk.mxu0 %vm3382_vm10, %v3327_v43  ;;  %vm3386_vm10 = vnez %v3314_v57  ;;  %vm3387_vm9 = vnez %v3316_v62  ;;  %v940_v37 = vrot.slane %v2781_v27, %v932_v4 }
  0xfe   :  { %1836 = vmatprep.subr.mxu1 %v3334_v34  ;;  %1631 = vmatpush3.msk.msra.mxu0 %vm3383_vm12, %v3327_v43  ;;  %vm3388_vm12 = vnez %v3318_v63 }
  0xff   :  { %1837 = vmatpush3.msk.msra.mxu1 %vm3384_vm2, %v3327_v43  ;;  %1632 = vmatprep.subr.msk.mxu0 %vm3385_vm0, %v3327_v43  ;;  %vm3391_vm0 = vnez %v3390_v42  ;;  %vm3396_vm2 = vnez %v3331_v12 }
 0x100   :  { %1838 = vmatprep.subr.mxu1 %v3334_v34  ;;  %1633 = vmatpush3.msk.msra.mxu0 %vm3386_vm10, %v3327_v43  ;;  %vm3393_vm10 = vnez %v3392_v24 }
 0x101   :  { %1839 = vmatpush3.msk.msra.mxu1 %vm3387_vm9, %v3327_v43  ;;  %1634 = vmatprep.subr.msk.mxu0 %vm3388_vm12, %v3327_v43  ;;  %vm3394_vm9 = vnez %v3326_v40  ;;  %vm3395_vm12 = vnez %v3329_v46 }
 0x102   :  { %1840 = vmatprep.subr.mxu1 %v3334_v34  ;;  %1635 = vmatpush3.msk.msra.mxu0 %vm3391_vm0, %v3327_v43  ;;  %vm3397_vm0 = vnez %v3333_v1 }
 0x103   :  { %1841 = vmatpush3.msk.msra.mxu1 %vm3393_vm10, %v3327_v43  ;;  %1636 = vmatprep.subr.msk.mxu0 %vm3394_vm9, %v3327_v43  ;;  %vm3405_vm9 = vnez %v3347_v0  ;;  %vm3406_vm10 = vnez %v3351_v41 }
 0x104   :  { %1842 = vmatprep.subr.mxu1 %v3334_v34  ;;  %1637 = vmatpush3.msk.msra.mxu0 %vm3395_vm12, %v3327_v43  ;;  %vm3400_vm12 = vnez %v3399_v60 }
 0x105   :  { %1843 = vmatpush3.msk.msra.mxu1 %vm3396_vm2, %v3327_v43  ;;  %1638 = vmatprep.subr.msk.mxu0 %vm3397_vm0, %v3327_v43  ;;  %vm3402_vm2 = vnez %v3401_v18  ;;  %vm3404_vm0 = vnez %v3403_v28 }
 0x106   :  { %1844 = vmatprep.subr.mxu1 %v3334_v34  ;;  %1639 = vmatpush3.msk.msra.mxu0 %vm3400_vm12, %v3327_v43  ;;  %vm3407_vm12 = vnez %v3353_v31 }
 0x107   :  { %1845 = vmatpush3.msk.msra.mxu1 %vm3402_vm2, %v3327_v43  ;;  %1640 = vmatprep.subr.msk.mxu0 %vm3404_vm0, %v3327_v43  ;;  %vm3411_vm0 = vnez %v3359_v10 }
 0x108   :  { %1846 = vmatprep.subr.mxu1 %v3334_v34  ;;  %1641 = vmatpush3.msk.msra.mxu0 %vm3405_vm9, %v3327_v43  ;;  %vm3408_vm9 = vnez %v3355_v17 }
 0x109   :  { %1847 = vmatpush3.msk.msra.mxu1 %vm3406_vm10, %v3327_v43  ;;  %1642 = vmatprep.subr.msk.mxu0 %vm3407_vm12, %v3327_v43  ;;  %vm3409_vm10 = vnez %v3357_v59  ;;  %vm3410_vm12 = vnez %v3349_v13 }
 0x10a   :  { %1848 = vmatprep.subr.mxu1 %v3334_v34  ;;  %1643 = vmatpush3.msk.msra.mxu0 %vm2495_vm13, %v3327_v43 }
 0x10b   :  { %1849 = vmatpush3.msk.msra.mxu1 %vm3408_vm9, %v3327_v43  ;;  %1644 = vmatprep.subr.msk.mxu0 %vm3409_vm10, %v3327_v43 }
 0x10c   :  { %1850 = vmatprep.subr.mxu1 %v3334_v34  ;;  %1645 = vmatpush3.msk.msra.mxu0 %vm3410_vm12, %v3327_v43 }
 0x10d   :  { %1851 = vmatpush3.msk.msra.mxu1 %vm3411_vm0, %v3327_v43  ;;  %1646 = vmatprep.subr.msk.mxu0 %vm2571_vm14, %v3327_v43  ;;  %vm3415_vm14 = vnez %v3414_v16  ;;  %vm3417_vm0 = vnez %v3416_v47 }
 0x10e   :  { %1853 = vmatmul.mubr.f32.vlgmr.msra.gmra.mxu1 %v2613_v22  ;;  %1855 = vmatprep.subr.mxu1 %v3334_v34  ;;  %v933_v22 = vrot.slane %v926_v52, %v932_v4 }
 0x10f   :  { %1647 = vmatpush3.msk.msra.mxu0 %vm2566_vm11, %v3327_v43  ;;  %1856 = vmatpush3.msk.msra.mxu1 %vm2147_vm15, %v3327_v43  ;;  %vm3419_vm15 = vnez %v3418_v26 }
 0x110   :  { %1648 = vmatprep.subr.msk.mxu0 %vm3415_vm14, %v3327_v43  ;;  %1857 = vmatprep.subr.mxu1 %v3334_v34 }
 0x111   :  { %1649 = vmatpush3.msk.msra.mxu0 %vm3417_vm0, %v3327_v43  ;;  %1858 = vmatpush3.msk.msra.mxu1 %vm2156_vm1, %v3327_v43 }
 0x112   :  { %809 = vmatmul.mubr.f32.vlgmr.msra.gmra.mxu0 %v2617_v55  ;;  %1670 = vmatprep.subr.msk.mxu0 %vm3419_vm15, %v3327_v43  ;;  %v941_v55 = vcombine.low %v933_v22, %v940_v37 }
 0x113   :  { %1859 = vmatprep.subr.mxu1 %v3334_v34  ;;  %1671 = vmatpush3.msk.msra.mxu0 %vm2172_vm3, %v3327_v43 }
 0x114   :  { %1860 = vmatpush3.msk.msra.mxu1 %vm2177_vm4, %v3327_v43  ;;  %1672 = vmatprep.subr.msk.mxu0 %vm2186_vm5, %v3327_v43  ;;  %vm3420_vm5 = vnez %v3284_v6  ;;  %vm3421_vm4 = vnez %v3286_v29  ;;  %v948_v52 = vrot.slane %v941_v55, %v932_v4 }
 0x115   :  { %1861 = vmatprep.subr.mxu1 %v3334_v34  ;;  %1673 = vmatpush3.msk.msra.mxu0 %vm2191_vm6, %v3327_v43  ;;  %vm3422_vm6 = vnez %v3288_v35 }
 0x116   :  { %1862 = vmatpush3.msk.msra.mxu1 %vm2218_vm7, %v3327_v43  ;;  %1674 = vmatprep.subr.msk.mxu0 %vm2227_vm8, %v3327_v43  ;;  %vm3423_vm7 = vnez %v3290_v36  ;;  %vm3424_vm8 = vnez %v3292_v38  ;;  %v950_v4 = vsub.f32 %v2689_v19, %v948_v52 }
 0x117   :  { %1863 = vmatprep.subr.mxu1 %v3334_v34  ;;  %1675 = vmatpush3.msk.msra.mxu0 %vm3420_vm5, %v3327_v43  ;;  %vm3425_vm5 = vnez %v3294_v39 }
 0x118   :  { %1864 = vmatpush3.msk.msra.mxu1 %vm3421_vm4, %v3327_v43  ;;  %1676 = vmatprep.subr.msk.mxu0 %vm3422_vm6, %v3327_v43  ;;  %vm3426_vm6 = vnez %v3296_v61  ;;  %vm3427_vm4 = vnez %v3298_v9  ;;  %v959_v19 = vrot.slane %v950_v4, %v3389_v21  ;;  %v963_v21 = vrot.slane %v950_v4, %v3398_v5 }
 0x119   :  { %1865 = vmatprep.subr.mxu1 %v3334_v34  ;;  %1677 = vmatpush3.msk.msra.mxu0 %vm3423_vm7, %v3327_v43  ;;  %vm3428_vm7 = vnez %v3300_v44  ;;  %v955_v5 = vrot.slane %v950_v4, %v2019_v11 }
 0x11a   :  { %1866 = vmatpush3.msk.msra.mxu1 %vm3424_vm8, %v3327_v43  ;;  %1678 = vmatprep.subr.msk.mxu0 %vm3425_vm5, %v3327_v43  ;;  %vm3429_vm8 = vnez %v3302_v49  ;;  %vm3430_vm5 = vnez %v3304_v50 }
 0x11b   :  { %1867 = vmatprep.subr.mxu1 %v3334_v34  ;;  %1679 = vmatpush3.msk.msra.mxu0 %vm3426_vm6, %v3327_v43  ;;  %vm3431_vm6 = vnez %v3306_v51 }
 0x11c   :  { %1868 = vmatpush3.msk.msra.mxu1 %vm3427_vm4, %v3327_v43  ;;  %1680 = vmatprep.subr.msk.mxu0 %vm3428_vm7, %v3327_v43  ;;  %vm3432_vm7 = vnez %v3308_v53  ;;  %vm3433_vm4 = vnez %v3310_v54 }
 0x11d   :  { %1869 = vmatprep.subr.mxu1 %v3334_v34  ;;  %1681 = vmatpush3.msk.msra.mxu0 %vm3429_vm8, %v3327_v43  ;;  %vm3434_vm8 = vnez %v3312_v48 }
 0x11e   :  { %1870 = vmatpush3.msk.msra.mxu1 %vm3430_vm5, %v3327_v43  ;;  %1682 = vmatprep.subr.msk.mxu0 %vm3431_vm6, %v3327_v43  ;;  %vm3435_vm5 = vnez %v3314_v57  ;;  %vm3436_vm6 = vnez %v3316_v62 }
 0x11f   :  { %1871 = vmatprep.subr.mxu1 %v3334_v34  ;;  %1683 = vmatpush3.msk.msra.mxu0 %vm3432_vm7, %v3327_v43  ;;  %vm3437_vm7 = vnez %v3318_v63 }
 0x120   :  { %1872 = vmatpush3.msk.msra.mxu1 %vm3433_vm4, %v3327_v43  ;;  %1684 = vmatprep.subr.msk.mxu0 %vm3434_vm8, %v3327_v43  ;;  %vm3438_vm8 = vnez %v3390_v42  ;;  %vm3439_vm4 = vnez %v3392_v24 }
 0x121   :  { %1873 = vmatprep.subr.mxu1 %v3334_v34  ;;  %1685 = vmatpush3.msk.msra.mxu0 %vm3435_vm5, %v3327_v43  ;;  %vm3440_vm5 = vnez %v3326_v40 }
 0x122   :  { %1874 = vmatpush3.msk.msra.mxu1 %vm3436_vm6, %v3327_v43  ;;  %1686 = vmatprep.subr.msk.mxu0 %vm3437_vm7, %v3327_v43  ;;  %vm3441_vm7 = vnez %v3329_v46  ;;  %vm3442_vm6 = vnez %v3331_v12 }
 0x123   :  { %1875 = vmatprep.subr.mxu1 %v3334_v34  ;;  %1687 = vmatpush3.msk.msra.mxu0 %vm3438_vm8, %v3327_v43  ;;  %vm3443_vm8 = vnez %v3333_v1 }
 0x124   :  { %1876 = vmatpush3.msk.msra.mxu1 %vm3439_vm4, %v3327_v43  ;;  %1688 = vmatprep.subr.msk.mxu0 %vm3440_vm5, %v3327_v43  ;;  %vm3444_vm5 = vnez %v3399_v60 }
 0x125   :  { %1031 = vmatprep.mubr.f32.mxu0 %v959_v19  ;;  %1877 = vmatprep.subr.mxu1 %v3334_v34 }
 0x126   :  { %1689 = vmatpush3.msk.msra.mxu0 %vm3441_vm7, %v3327_v43  ;;  %1878 = vmatpush3.msk.msra.mxu1 %vm3442_vm6, %v3327_v43  ;;  %vm3445_vm7 = vnez %v3403_v28  ;;  %vm3446_vm6 = vnez %v3347_v0 }
 0x127   :  { %1690 = vmatprep.subr.msk.mxu0 %vm3443_vm8, %v3327_v43  ;;  %1879 = vmatprep.subr.mxu1 %v3334_v34  ;;  %vm3447_vm8 = vnez %v3351_v41 }
 0x128   :  { %1691 = vmatpush3.msk.msra.mxu0 %vm3444_vm5, %v3327_v43  ;;  %1880 = vmatpush3.msk.msra.mxu1 %vm3402_vm2, %v3327_v43  ;;  %vm3448_vm5 = vnez %v3353_v31 }
 0x129   :  { %1692 = vmatprep.subr.msk.mxu0 %vm3445_vm7, %v3327_v43  ;;  %1881 = vmatprep.subr.mxu1 %v3334_v34 }
 0x12a   :  { %1693 = vmatpush3.msk.msra.mxu0 %vm3446_vm6, %v3327_v43  ;;  %1882 = vmatpush3.msk.msra.mxu1 %vm3447_vm8, %v3327_v43 }
 0x12b   :  { %1694 = vmatprep.subr.msk.mxu0 %vm3448_vm5, %v3327_v43  ;;  %1883 = vmatprep.subr.mxu1 %v3334_v34  ;;  %vm3449_vm5 = vnez %v3359_v10 }
 0x12c   :  { %1695 = vmatpush3.msk.msra.mxu0 %vm2495_vm13, %v3327_v43  ;;  %1884 = vmatpush3.msk.msra.mxu1 %vm3408_vm9, %v3327_v43  ;;  %vm3450_vm13 = vmmov 0   ;;  %vm3451_vm9 = vnez %v3364_v20 }
 0x12d   :  { %1696 = vmatprep.subr.msk.mxu0 %vm3409_vm10, %v3327_v43  ;;  %1885 = vmatprep.subr.mxu1 %v3334_v34 }
 0x12e   :  { %1697 = vmatpush3.msk.msra.mxu0 %vm3410_vm12, %v3327_v43  ;;  %1886 = vmatpush3.msk.msra.mxu1 %vm3449_vm5, %v3327_v43  ;;  %vm3452_vm12 = vnez %v3265_v58 }
 0x12f   :  { %1887 = vmatprep.mubr.msk.f32.mxu1 %vm3450_vm13, %v3334_v34  ;;  %1698 = vmatprep.subr.msk.mxu0 %vm3451_vm9, %v3327_v43 }
 0x130   :  { %1888 = vmatmul.mubr.f32.vlgmr.msra.gmra.mxu1 %v963_v21  ;;  %1890 = vmatprep.subr.mxu1 %v3334_v34 }
 0x131   :  { %1699 = vmatpush3.msk.msra.mxu0 %vm2566_vm11, %v3327_v43  ;;  %1891 = vmatpush3.msk.msra.mxu1 %vm3452_vm12, %v3327_v43  ;;  %vm3453_vm12 = vnez %v3274_v25 }
 0x132   :  { %1700 = vmatprep.subr.msk.mxu0 %vm3415_vm14, %v3327_v43  ;;  %1892 = vmatprep.subr.mxu1 %v3334_v34 }
 0x133   :  { %1701 = vmatpush3.msk.msra.mxu0 %vm3417_vm0, %v3327_v43  ;;  %1893 = vmatpush3.msk.msra.mxu1 %vm2156_vm1, %v3327_v43  ;;  %vm3454_vm1 = vnez %v3276_v32  ;;  %vm3456_vm0 = vnez %v3280_v45 }
 0x134   :  { %1032 = vmatmul.mubr.f32.vlgmr.msra.gmra.mxu0 %v955_v5  ;;  %1722 = vmatprep.subr.msk.mxu0 %vm3419_vm15, %v3327_v43  ;;  %vm3455_vm15 = vnez %v3278_v33 }
 0x135   :  { %1894 = vmatprep.subr.mxu1 %v3334_v34  ;;  %1723 = vmatpush3.msk.msra.mxu0 %vm2172_vm3, %v3327_v43  ;;  %vm3457_vm3 = vnez %v3282_v56 }
 0x136   :  { %1171 = vmatprep.mubr.f32.mxu0 %v2759_v3  ;;  %1895 = vmatpush3.msk.msra.mxu1 %vm3453_vm12, %v3327_v43  ;;  %vm3458_vm12 = vnez %v3284_v6 }
 0x137   :  { %1724 = vmatprep.subr.msk.mxu0 %vm3454_vm1, %v3327_v43  ;;  %1896 = vmatprep.subr.mxu1 %v3334_v34  ;;  %vm3459_vm1 = vnez %v3286_v29 }
 0x138   :  { %1725 = vmatpush3.msk.msra.mxu0 %vm3455_vm15, %v3327_v43  ;;  %1897 = vmatpush3.msk.msra.mxu1 %vm3456_vm0, %v3327_v43  ;;  %vm3460_vm15 = vnez %v3288_v35  ;;  %vm3461_vm0 = vnez %v3290_v36 }
 0x139   :  { %1726 = vmatprep.subr.msk.mxu0 %vm3457_vm3, %v3327_v43  ;;  %1898 = vmatprep.subr.mxu1 %v3334_v34  ;;  %vm3462_vm3 = vnez %v3292_v38 }
 0x13a   :  { %1727 = vmatpush3.msk.msra.mxu0 %vm3458_vm12, %v3327_v43  ;;  %1899 = vmatpush3.msk.msra.mxu1 %vm3459_vm1, %v3327_v43  ;;  %vm3463_vm12 = vnez %v3294_v39  ;;  %vm3464_vm1 = vnez %v3296_v61 }
 0x13b   :  { %1728 = vmatprep.subr.msk.mxu0 %vm3460_vm15, %v3327_v43  ;;  %1900 = vmatprep.subr.mxu1 %v3334_v34  ;;  %vm3465_vm15 = vnez %v3298_v9 }
 0x13c   :  { %1729 = vmatpush3.msk.msra.mxu0 %vm3461_vm0, %v3327_v43  ;;  %1901 = vmatpush3.msk.msra.mxu1 %vm3462_vm3, %v3327_v43  ;;  %vm3466_vm0 = vnez %v3300_v44  ;;  %vm3467_vm3 = vnez %v3302_v49 }
 0x13d   :  { %1730 = vmatprep.subr.msk.mxu0 %vm3463_vm12, %v3327_v43  ;;  %1902 = vmatprep.subr.mxu1 %v3334_v34  ;;  %vm3468_vm12 = vnez %v3304_v50 }
 0x13e   :  { %1731 = vmatpush3.msk.msra.mxu0 %vm3464_vm1, %v3327_v43  ;;  %1903 = vmatpush3.msk.msra.mxu1 %vm3465_vm15, %v3327_v43  ;;  %vm3469_vm1 = vnez %v3306_v51  ;;  %vm3470_vm15 = vnez %v3308_v53 }
 0x13f   :  { %1732 = vmatprep.subr.msk.mxu0 %vm3466_vm0, %v3327_v43  ;;  %1904 = vmatprep.subr.mxu1 %v3334_v34  ;;  %vm3471_vm0 = vnez %v3310_v54 }
 0x140   :  { %1733 = vmatpush3.msk.msra.mxu0 %vm3467_vm3, %v3327_v43  ;;  %1905 = vmatpush3.msk.msra.mxu1 %vm3468_vm12, %v3327_v43  ;;  %vm3472_vm3 = vnez %v3312_v48  ;;  %vm3473_vm12 = vnez %v3314_v57 }
 0x141   :  { %1734 = vmatprep.subr.msk.mxu0 %vm3469_vm1, %v3327_v43  ;;  %1906 = vmatprep.subr.mxu1 %v3334_v34  ;;  %vm3474_vm1 = vnez %v3316_v62 }
 0x142   :  { %1735 = vmatpush3.msk.msra.mxu0 %vm3470_vm15, %v3327_v43  ;;  %1907 = vmatpush3.msk.msra.mxu1 %vm3471_vm0, %v3327_v43  ;;  %vm3475_vm15 = vnez %v3318_v63  ;;  %vm3476_vm0 = vnez %v3390_v42  ;;  %v1253_v63 = vmul.u32 32, %v3412_v30 }
 0x143   :  { %1736 = vmatprep.subr.msk.mxu0 %vm3472_vm3, %v3327_v43  ;;  %1908 = vmatprep.subr.mxu1 %v3334_v34  ;;  %vm3477_vm3 = vnez %v3326_v40 }
 0x144   :  { %1737 = vmatpush3.msk.msra.mxu0 %vm3473_vm12, %v3327_v43  ;;  %1909 = vmatpush3.msk.msra.mxu1 %vm3474_vm1, %v3327_v43  ;;  %vm3478_vm12 = vnez %v3329_v46  ;;  %vm3479_vm1 = vnez %v3331_v12 }
 0x145   :  { %1738 = vmatprep.subr.msk.mxu0 %vm3475_vm15, %v3327_v43  ;;  %1910 = vmatprep.subr.mxu1 %v3334_v34  ;;  %vm3480_vm15 = vnez %v3333_v1 }
 0x146   :  { %1739 = vmatpush3.msk.msra.mxu0 %vm3476_vm0, %v3327_v43  ;;  %1911 = vmatpush3.msk.msra.mxu1 %vm3439_vm4, %v3327_v43  ;;  %vm3481_vm4 = vnez %v3399_v60  ;;  %vm3482_vm0 = vnez %v3353_v31 }
 0x147   :  { %1740 = vmatprep.subr.msk.mxu0 %vm3477_vm3, %v3327_v43  ;;  %1912 = vmatprep.subr.mxu1 %v3334_v34 }
 0x148   :  { %1741 = vmatpush3.msk.msra.mxu0 %vm3478_vm12, %v3327_v43  ;;  %1913 = vmatpush3.msk.msra.mxu1 %vm3479_vm1, %v3327_v43 }
 0x149   :  { %1742 = vmatprep.subr.msk.mxu0 %vm3480_vm15, %v3327_v43  ;;  %1914 = vmatprep.subr.mxu1 %v3334_v34 }
 0x14a   :  { %1743 = vmatpush3.msk.msra.mxu0 %vm3481_vm4, %v3327_v43  ;;  %1915 = vmatpush3.msk.msra.mxu1 %vm3402_vm2, %v3327_v43  ;;  %vm3483_vm2 = vnez %v3345_v7 }
 0x14b   :  { %1744 = vmatprep.subr.msk.mxu0 %vm3445_vm7, %v3327_v43  ;;  %1916 = vmatprep.subr.mxu1 %v3334_v34  ;;  %vm3484_vm7 = vnez %v3355_v17 }
 0x14c   :  { %1745 = vmatpush3.msk.msra.mxu0 %vm3446_vm6, %v3327_v43  ;;  %1917 = vmatpush3.msk.msra.mxu1 %vm3447_vm8, %v3327_v43  ;;  %vm3485_vm6 = vnez %v3349_v13  ;;  %vm28_vm8 = vcmask 253952  }
 0x14d   :  { %1746 = vmatprep.subr.msk.mxu0 %vm3482_vm0, %v3327_v43  ;;  %1918 = vmatprep.subr.mxu1 %v3334_v34  ;;  %29 = vst.msk [vmem:[#allocation2] sm:$0x1] %vm28_vm8, %v3334_v34 }
 0x14e   :  { %1747 = vmatpush3.msk.msra.mxu0 %vm3483_vm2, %v3327_v43  ;;  %1919 = vmatpush3.msk.msra.mxu1 %vm3484_vm7, %v3327_v43 }
 0x14f   :  { %1748 = vmatprep.subr.msk.mxu0 %vm3409_vm10, %v3327_v43  ;;  %1920 = vmatprep.subr.mxu1 %v3334_v34 }
 0x150   :  { %1749 = vmatpush3.msk.msra.mxu0 %vm3485_vm6, %v3327_v43  ;;  %1921 = vmatpush3.msk.msra.mxu1 %vm3449_vm5, %v3327_v43  ;;  %vm3486_vm5 = vnez %v3416_v47 }
 0x151   :  { %1922 = vmatprep.mubr.msk.f32.mxu1 %vm3450_vm13, %v3334_v34  ;;  %1750 = vmatprep.subr.msk.mxu0 %vm3451_vm9, %v3327_v43 }
 0x152   :  { %1923 = vmatmul.mubr.f32.vlgmr.msra.gmra.mxu1 %v2781_v27  ;;  %1751 = vmatpush3.msk.msra.mxu0 %vm2566_vm11, %v3327_v43 }
 0x153   :  { %1752 = vmatprep.subr.msk.mxu0 %vm3415_vm14, %v3327_v43 }
 0x154   :  { %1753 = vmatpush3.msk.msra.mxu0 %vm3486_vm5, %v3327_v43  ;;  %v3487_v43 = vld [vmem:[#allocation9_spill] sm:$0xff]  ;;  %v1257_v7 = vld [vmem:[#allocation2] sm:$0x1] }
 0x155   :  { %1172 = vmatmul.mubr.f32.vlgmr.msra.gmra.mxu0 %v2757_v15  ;;  %v1254_v46 = vadd.s32 %v1253_v63, %v3487_v43 }
 0x157   :  { %vm1255_vm9 = vcmp.lt.s32.totalorder %v1254_v46, 8 }
 0x1ad   :  { %v740_v11 = vpop.f32.mrf.mxu1 }
 0x1af   :  { %v1819_v58 = vpop.f32.mrf.mxu1 }
 0x1b1   :  { %v1598_v8 = vpop.f32.mrf.mxu0 }
 0x1b3   :  { %v1599_v23 = vpop.f32.mrf.mxu0 }
 0x1b4   :  { %v1600_v33 = vadd.f32 %v1599_v23, %v1598_v8 }
 0x1b6   :  { %v741_v6 = vadd.f32 %v1600_v33, %v740_v11 }
 0x1ce   :  { %v880_v25 = vpop.f32.mrf.mxu1 }
 0x1d0   :  { %v1854_v32 = vpop.f32.mrf.mxu1 }
 0x1d2   :  { %v1650_v45 = vpop.f32.mrf.mxu0 }
 0x1d4   :  { %v1651_v56 = vpop.f32.mrf.mxu0 }
 0x1d5   :  { %v1652_v29 = vadd.f32 %v1651_v56, %v1650_v45 }
 0x1d7   :  { %v811_v35 = vadd.f32 %v1652_v29, %v741_v6 }
 0x1d9   :  { %v881_v36 = vadd.f32 %v880_v25, %v811_v35 }
 0x1f0   :  { %v1103_v38 = vpop.f32.mrf.mxu1 }
 0x1f2   :  { %v1889_v39 = vpop.f32.mrf.mxu1 }
 0x1f4   :  { %v1702_v61 = vpop.f32.mrf.mxu0 }
 0x1f6   :  { %v1703_v9 = vpop.f32.mrf.mxu0 }
 0x1f7   :  { %v1704_v49 = vadd.f32 %v1703_v9, %v1702_v61 }
 0x1f9   :  { %v1104_v54 = vadd.f32 %v1704_v49, %v1103_v38 }
 0x212   :  { %v1243_v44 = vpop.f32.mrf.mxu1 }
 0x214   :  { %v1924_v50 = vpop.f32.mrf.mxu1 }
 0x215   :  { %v1754_v51 = vpop.f32.mrf.mxu0 }
 0x217   :  { %v1755_v53 = vpop.f32.mrf.mxu0 }
 0x218   :  { %v1756_v48 = vadd.f32 %v1755_v53, %v1754_v51 }
 0x21a   :  { %v1174_v57 = vadd.f32 %v1756_v48, %v1104_v54 }
 0x21c   :  { %v1244_v62 = vadd.f32 %v1243_v44, %v1174_v57 }
 0x21e   :  { %1936 = vlog2.f32 %v1244_v62 }
 0x22b   :  { %v1937_v40 = vpop.eup %1936 }
 0x22c   :  { %v1248_v12 = vmul.f32 0.6931472, %v1937_v40 }
 0x22e   :  { %v1249_v1 = vadd.f32 %v1248_v12, %v2605_v2 }
 0x230   :  { %v1250_v34 = vsub.f32 %v1249_v1, %v881_v36 }
 0x232   :  { %v1256_v0 = vsel %vm1255_vm9, %v1250_v34, 0.0 }
 0x233   :  { %v1259_v13 = vadd.f32 %v1257_v7, %v1256_v0 }
 0x235   :  { %1261 = vst.msk [vmem:[#allocation2] sm:$0x1] %vm28_vm8, %v1259_v13 }
 0x23c   :  { %v1265_v41 = vld [vmem:[#allocation2] sm:$0x1] }
 0x23d   :  { %v1266_v31 = vsel %vm28_vm8, %v1265_v41, 0.0 }
 0x23e   :  { %1267 = vadd.xlane.f32.xlu0 %v1266_v31 }
 0x2c7   :  { %v1268_v17 = vpop.xlane.xlu0 %1267 }
 0x2c8   :  { %v1269_v59 = vrot.slane %v1268_v17, 4 }
 0x2ca   :  { %v1270_v10 = vadd.f32 %v1269_v59, %v1268_v17 }
 0x2cc   :  { %v1271_v20 = vrot.slane %v1270_v10, 2 }
 0x2ce   :  { %v1272_v42 = vadd.f32 %v1271_v20, %v1270_v10 }
 0x2d0   :  { %v1273_v24 = vrot.slane %v1272_v42, 1 }
 0x2d2   :  { %v1274_v60 = vadd.f32 %v1273_v24, %v1272_v42 }
 0x2d4   :  { %1925 = vpush %v1274_v60 }
 0x305   :  { %s1926_s1 = spop %1925 }
 0x306   :  { %s1278_s16 = smul.f32 0.125, %s1926_s1 }
 0x308   :  { %1280 = sst [smem:[#allocation6]] %s1278_s16 }
 0x309   :  { %1288 = dma.smem_to_hbm %s1976_s17, 16, %s3141_s2, [#allocation5]  }
 0x30a   :  { %1968 = dma.done.wait [#allocation5], 16  }
 0x30b   :  { %1969 = vsyncadd [#allocation5], 4294967280 }
 0x30c   :  { %1292 = sfence }
 0x30d   :  { %1293 = vsyncpa [#allocation4], 1 }
 0x30e   :  { %1294 = vsyncpa [#allocation5], 1 }

</bundles_post_ra>
